<compile_context>
chip_gen: v7x
topology: tpu7x:2x2x1
jax: 0.10.0
libtpu: 0.0.40
codegen_flags: <defaults>
</compile_context>

<pallas_src>
import jax
import jax.numpy as jnp
from jax.experimental import pallas as pl
from jax.experimental.pallas import tpu as pltpu


def _patch_embed_kernel(x_ref, w_ref, c_cls_ref, c_row_ref, o_ref):
    """One batch tile.

    x_ref:     (1, Bt, N, 3) -- block of the ORIGINAL x; only the x[0] slice is ever DMA'd
    w_ref:     (3, F)        -- projection weight transposed (W.T), resident
    c_cls_ref: (1, F)        -- cls_token + positions[0]        (output row 0, no bias)
    c_row_ref: (N, F)        -- bias + positions[1:]            (output rows 1..N)
    o_ref:     (Bt, N+1, F)
    """
    x = x_ref[0].astype(jnp.float32)          # (Bt, N, 3): token in sublanes, channel in lanes
    w = w_ref[...]                            # (3, F)
    bt = o_ref.shape[0]
    f = o_ref.shape[2]

    # K=3 projection as three VPU broadcast-FMAs (no MXU).  The lane-broadcast of x[..., c]
    # and the sublane-broadcast of w[c] land in the XLU slot and stay hidden under the DMA.
    acc = c_row_ref[...][None, :, :] + x[:, :, 0:1] * w[0:1, :][None, :, :]
    acc = acc + x[:, :, 1:2] * w[1:2, :][None, :, :]
    acc = acc + x[:, :, 2:3] * w[2:3, :][None, :, :]

    # Rows 1..N: projected patches (+ bias + positions); row 0: cls token (+ positions[0]).
    o_ref[:, 1:, :] = acc.astype(o_ref.dtype)
    o_ref[:, 0:1, :] = jnp.broadcast_to(
        c_cls_ref[...][None, :, :], (bt, 1, f)).astype(o_ref.dtype)


def patch_embedding_forward(x, weight, bias, cls_token, positions, *, block_b=None,
                            out_dtype=jnp.float32, interpret=False):
    """Pallas implementation of PatchEmbedding.forward.

    x:         (S, B, N, 3)  -- only x[0] is used (as in the module); read in place, no copy
    weight:    (F, 3)        -- nn.Linear(3, F).weight
    bias:      (F,)          -- nn.Linear(3, F).bias
    cls_token: (1, 1, F)
    positions: (N+1, F)      -- module hardcodes 7 rows => N == 6
    returns:   (B, N+1, F) in `out_dtype` (default float32, matching PyTorch)
    """
    S, B, N, C = x.shape
    F = weight.shape[0]
    if C != 3 or weight.shape != (F, 3):
        raise ValueError("projection expects channels-last input with C == 3")
    if positions.shape != (N + 1, F):
        raise ValueError("positions must have shape (N+1, F); the module hardcodes 7 rows (N == 6)")
    n_tok = N + 1

    # O(F) parameter prep (negligible): fold cls/bias/positions into per-row additive constants.
    w_t = weight.astype(jnp.float32).T                                      # (3, F)
    pos = positions.astype(jnp.float32)                                     # (N+1, F)
    c_cls = cls_token.astype(jnp.float32).reshape(1, F) + pos[0:1]          # (1, F)  cls + pos[0]
    c_row = pos[1:] + bias.astype(jnp.float32).reshape(1, F)                # (N, F)  bias + pos[1:]

    # --- per-sample HBM/VMEM bytes of one block, with real (8, 128) tile padding ---
    out_itemsize = jnp.dtype(out_dtype).itemsize
    in_tile_bytes = (pl.cdiv(N, 8) * 8) * (pl.cdiv(C, 128) * 128) * x.dtype.itemsize
    out_tile_bytes = (pl.cdiv(n_tok, 8) * 8) * (pl.cdiv(F, 128) * 128) * out_itemsize
    per_sample = in_tile_bytes + out_tile_bytes

    # --- block size: >= 4 grid steps (v7x megacore + pipeline overlap), steps big enough to
    # amortize per-step overhead, and a double-buffered budget safe on v5e's 16 MiB default.
    if block_b is None:
        budget = 8 * 1024 * 1024
        vmem_cap = max(8, budget // (2 * per_sample))
        block_b = pl.cdiv(B, 4)          # aim for >= 4 grid steps
        block_b = max(block_b, 16)       # ...but keep steps worth the ~0.35us overhead
        block_b = min(block_b, vmem_cap)
    block_b = max(1, min(block_b, B))
    grid_b = pl.cdiv(B, block_b)         # ragged last block is masked by Pallas (safe: no
                                         # cross-sample reduction; OOB output rows discarded)

    block_bytes = 2 * block_b * per_sample              # double-buffered in + out blocks
    vmem_limit = int(min(max(2 * block_bytes, 16 * 1024 * 1024), 48 * 1024 * 1024))

    # Advisory cost for XLA's scheduler: real tiled/padded traffic, not logical element counts.
    bytes_accessed = int(grid_b * block_b * per_sample + 4 * F * (3 + 1 + N))
    flops = int(2 * B * N * C * F + B * n_tok * F)

    out = pl.pallas_call(
        _patch_embed_kernel,
        out_shape=jax.ShapeDtypeStruct((B, n_tok, F), out_dtype),
        grid=(grid_b,),
        in_specs=[
            # Read blocks of x[0] directly from the original 4-D array: no wrapper slice/pad/
            # flatten pass.  Trailing block dims (N, 3) equal the full array dims -> legal.
            pl.BlockSpec((1, block_b, N, C), lambda i: (0, i, 0, 0)),
            pl.BlockSpec((3, F), lambda i: (0, 0)),       # W.T, resident
            pl.BlockSpec((1, F), lambda i: (0, 0)),       # cls + pos[0], resident
            pl.BlockSpec((N, F), lambda i: (0, 0)),       # bias + pos[1:], resident
        ],
        out_specs=pl.BlockSpec((block_b, n_tok, F), lambda i: (i, 0, 0)),
        compiler_params=pltpu.CompilerParams(
            dimension_semantics=("parallel",),            # megacore splits the batch on v7x
            vmem_limit_bytes=vmem_limit,
        ),
        cost_estimate=pl.CostEstimate(flops=flops, transcendentals=0,
                                      bytes_accessed=bytes_accessed),
        interpret=interpret,
    )(x, w_t, c_cls, c_row)
    return out


def _reference(x, weight, bias, cls_token, positions):
    """Pure-JAX reference matching the PyTorch forward exactly."""
    x0 = x[0].astype(jnp.float32)
    proj = jnp.einsum("bnc,fc->bnf", x0, weight.astype(jnp.float32)) + bias.astype(jnp.float32)
    B = x0.shape[0]
    F = weight.shape[0]
    cls = jnp.broadcast_to(cls_token.astype(jnp.float32).reshape(1, 1, F), (B, 1, F))
    y = jnp.concatenate([cls, proj], axis=1)
    return y + positions.astype(jnp.float32)[None, :, :]


if __name__ == "__main__":
    key = jax.random.PRNGKey(0)
    k_x, k_w, k_b, k_cls, k_pos = jax.random.split(key, 5)

    # Shapes consistent with the module: x is (S, B, N=6, C=3); feature_dim F=128.
    S, B, N, C, F = 2, 256, 6, 3, 128
    x = jax.random.normal(k_x, (S, B, N, C), dtype=jnp.float32)
    weight = 0.1 * jax.random.normal(k_w, (F, C), dtype=jnp.float32)
    bias = 0.1 * jax.random.normal(k_b, (F,), dtype=jnp.float32)
    cls_token = jax.random.normal(k_cls, (1, 1, F), dtype=jnp.float32)
    positions = jax.random.normal(k_pos, (N + 1, F), dtype=jnp.float32)

    run = jax.jit(patch_embedding_forward)
    out = jax.block_until_ready(run(x, weight, bias, cls_token, positions))

    ref = _reference(x, weight, bias, cls_token, positions)
    assert out.shape == (B, N + 1, F), f"bad output shape {out.shape}"
    if not bool(jnp.allclose(out, ref, atol=1e-5, rtol=1e-5)):
        raise AssertionError("Pallas PatchEmbedding does not match the reference")

    # Ragged batch (B not divisible by block_b): exercises the masked last block path
    # (no wrapper pad / output slice).
    B2 = 90
    x2 = jax.random.normal(k_x, (S, B2, N, C), dtype=jnp.float32)
    out2 = jax.block_until_ready(run(x2, weight, bias, cls_token, positions))
    ref2 = _reference(x2, weight, bias, cls_token, positions)
    if not bool(jnp.allclose(out2, ref2, atol=1e-5, rtol=1e-5)):
        raise AssertionError("Pallas PatchEmbedding (ragged batch) does not match the reference")

    print("KERNEL_OK")
</pallas_src>

<mosaic_0001>
module attributes {stable_mosaic.version = 11 : i64} {
  func.func @_patch_embed_kernel(%arg0: i32, %arg1: memref<1x64x6x3xf32, #tpu.memory_space<vmem>>, %arg2: memref<3x128xf32, #tpu.memory_space<vmem>>, %arg3: memref<1x128xf32, #tpu.memory_space<vmem>>, %arg4: memref<6x128xf32, #tpu.memory_space<vmem>>, %arg5: memref<64x7x128xf32, #tpu.memory_space<vmem>>) attributes {dimension_semantics = [#tpu.dimension_semantics<parallel>], iteration_bounds = array<i64: 4>, scalar_prefetch = 0 : i64, scratch_operands = 0 : i64, tpu.core_type = #tpu.core_type<tc>, window_params = [{transform_indices = @transform_0, window_bounds = array<i64: 1, 64, 6, 3>}, {pipeline_mode = #tpu.pipeline_mode<synchronous>, transform_indices = @transform_1, window_bounds = array<i64: 3, 128>}, {pipeline_mode = #tpu.pipeline_mode<synchronous>, transform_indices = @transform_2, window_bounds = array<i64: 1, 128>}, {pipeline_mode = #tpu.pipeline_mode<synchronous>, transform_indices = @transform_3, window_bounds = array<i64: 6, 128>}, {transform_indices = @transform_4, window_bounds = array<i64: 64, 7, 128>}]} {
    %c0 = arith.constant 0 : index
    %c0_0 = arith.constant 0 : index
    %c0_1 = arith.constant 0 : index
    %c0_2 = arith.constant 0 : index
    %0 = vector.load %arg1[%c0, %c0_0, %c0_1, %c0_2] : memref<1x64x6x3xf32, #tpu.memory_space<vmem>>, vector<1x64x6x3xf32>
    %1 = vector.shape_cast %0 : vector<1x64x6x3xf32> to vector<64x6x3xf32>
    %c0_3 = arith.constant 0 : index
    %c0_4 = arith.constant 0 : index
    %2 = vector.load %arg2[%c0_3, %c0_4] : memref<3x128xf32, #tpu.memory_space<vmem>>, vector<3x128xf32>
    %c0_5 = arith.constant 0 : index
    %c0_6 = arith.constant 0 : index
    %3 = vector.load %arg4[%c0_5, %c0_6] : memref<6x128xf32, #tpu.memory_space<vmem>>, vector<6x128xf32>
    %4 = vector.shape_cast %3 : vector<6x128xf32> to vector<1x6x128xf32>
    %5 = vector.extract_strided_slice %1 {offsets = [0, 0, 0], sizes = [64, 6, 1], strides = [1, 1, 1]} : vector<64x6x3xf32> to vector<64x6x1xf32>
    %6 = vector.extract_strided_slice %2 {offsets = [0, 0], sizes = [1, 128], strides = [1, 1]} : vector<3x128xf32> to vector<1x128xf32>
    %7 = vector.shape_cast %6 : vector<1x128xf32> to vector<1x1x128xf32>
    %8 = vector.broadcast %5 : vector<64x6x1xf32> to vector<64x6x128xf32>
    %9 = vector.broadcast %7 : vector<1x1x128xf32> to vector<64x6x128xf32>
    %10 = arith.mulf %8, %9 : vector<64x6x128xf32>
    %11 = vector.broadcast %4 : vector<1x6x128xf32> to vector<64x6x128xf32>
    %12 = arith.addf %11, %10 : vector<64x6x128xf32>
    %13 = vector.extract_strided_slice %1 {offsets = [0, 0, 1], sizes = [64, 6, 1], strides = [1, 1, 1]} : vector<64x6x3xf32> to vector<64x6x1xf32>
    %14 = vector.extract_strided_slice %2 {offsets = [1, 0], sizes = [1, 128], strides = [1, 1]} : vector<3x128xf32> to vector<1x128xf32>
    %15 = vector.shape_cast %14 : vector<1x128xf32> to vector<1x1x128xf32>
    %16 = vector.broadcast %13 : vector<64x6x1xf32> to vector<64x6x128xf32>
    %17 = vector.broadcast %15 : vector<1x1x128xf32> to vector<64x6x128xf32>
    %18 = arith.mulf %16, %17 : vector<64x6x128xf32>
    %19 = arith.addf %12, %18 : vector<64x6x128xf32>
    %20 = vector.extract_strided_slice %1 {offsets = [0, 0, 2], sizes = [64, 6, 1], strides = [1, 1, 1]} : vector<64x6x3xf32> to vector<64x6x1xf32>
    %21 = vector.extract_strided_slice %2 {offsets = [2, 0], sizes = [1, 128], strides = [1, 1]} : vector<3x128xf32> to vector<1x128xf32>
    %22 = vector.shape_cast %21 : vector<1x128xf32> to vector<1x1x128xf32>
    %23 = vector.broadcast %20 : vector<64x6x1xf32> to vector<64x6x128xf32>
    %24 = vector.broadcast %22 : vector<1x1x128xf32> to vector<64x6x128xf32>
    %25 = arith.mulf %23, %24 : vector<64x6x128xf32>
    %26 = arith.addf %19, %25 : vector<64x6x128xf32>
    %c0_7 = arith.constant 0 : index
    %c1 = arith.constant 1 : index
    %c0_8 = arith.constant 0 : index
    %27 = vector.load %arg5[%c0_7, %c1, %c0_8] : memref<64x7x128xf32, #tpu.memory_space<vmem>>, vector<64x6x128xf32>
    tpu.vector_store %arg5[%c0_7, %c1, %c0_8], %26 {strides = array<i32>} : memref<64x7x128xf32, #tpu.memory_space<vmem>>, vector<64x6x128xf32>,
    %c0_9 = arith.constant 0 : index
    %c0_10 = arith.constant 0 : index
    %28 = vector.load %arg3[%c0_9, %c0_10] : memref<1x128xf32, #tpu.memory_space<vmem>>, vector<1x128xf32>
    %29 = vector.shape_cast %28 : vector<1x128xf32> to vector<1x1x128xf32>
    %30 = vector.shape_cast %29 : vector<1x1x128xf32> to vector<1x1x128xf32>
    %31 = vector.broadcast %30 : vector<1x1x128xf32> to vector<64x1x128xf32>
    %c0_11 = arith.constant 0 : index
    %c0_12 = arith.constant 0 : index
    %c0_13 = arith.constant 0 : index
    %32 = vector.load %arg5[%c0_11, %c0_12, %c0_13] : memref<64x7x128xf32, #tpu.memory_space<vmem>>, vector<64x1x128xf32>
    tpu.vector_store %arg5[%c0_11, %c0_12, %c0_13], %31 {strides = array<i32>} : memref<64x7x128xf32, #tpu.memory_space<vmem>>, vector<64x1x128xf32>,
    return
  }
  func.func @transform_0(%arg0: i32) -> (i32, i32, i32, i32) {
    %c0_i32 = arith.constant 0 : i32
    %c0_i32_0 = arith.constant 0 : i32
    %c0_i32_1 = arith.constant 0 : i32
    %c0_i32_2 = arith.constant 0 : i32
    return %c0_i32, %arg0, %c0_i32_0, %c0_i32_1 : i32, i32, i32, i32
  }
  func.func @transform_1(%arg0: i32) -> (i32, i32) {
    %c0_i32 = arith.constant 0 : i32
    %c0_i32_0 = arith.constant 0 : i32
    %c0_i32_1 = arith.constant 0 : i32
    return %c0_i32, %c0_i32_0 : i32, i32
  }
  func.func @transform_2(%arg0: i32) -> (i32, i32) {
    %c0_i32 = arith.constant 0 : i32
    %c0_i32_0 = arith.constant 0 : i32
    %c0_i32_1 = arith.constant 0 : i32
    return %c0_i32, %c0_i32_0 : i32, i32
  }
  func.func @transform_3(%arg0: i32) -> (i32, i32) {
    %c0_i32 = arith.constant 0 : i32
    %c0_i32_0 = arith.constant 0 : i32
    %c0_i32_1 = arith.constant 0 : i32
    return %c0_i32, %c0_i32_0 : i32, i32
  }
  func.func @transform_4(%arg0: i32) -> (i32, i32, i32) {
    %c0_i32 = arith.constant 0 : i32
    %c0_i32_0 = arith.constant 0 : i32
    %c0_i32_1 = arith.constant 0 : i32
    return %arg0, %c0_i32, %c0_i32_0 : i32, i32, i32
  }
}

</mosaic_0001>

<bundles_post_ra>
// kernel: patch_embedding_forward.1
= control target key start
LH: loop header
LB: loop body
LE: loop exit
PB: predicated region body
PF: predicated region fallthrough
CT: control target
= control target key end

     0   :  { %s1745_s15 = smov 0   ;;  %s3027_s0 = inlined_call_operand.vmem [shape: f32[2,256,6,3], index: 0, kind: input, shape index: {}]   ;;  %s3028_s1 = inlined_call_operand.vmem [shape: f32[3,128], index: 1, kind: input, shape index: {}]   ;;  %s3029_s2 = inlined_call_operand.vmem [shape: f32[1,128], index: 2, kind: input, shape index: {}]   ;;  %s3030_s3 = inlined_call_operand.vmem [shape: f32[6,128], index: 3, kind: input, shape index: {}]   ;;  %s3031_s4 = inlined_call_operand.vmem [shape: f32[256,7,128], index: 4, kind: output, shape index: {}]  }
   0x1 LB: > { %s1680_s16 = sadd.s32 4294967295, %s1715_s15   ;;  %p1684_p0 = scmp.ge.s32.totalorder %s1715_s15, 1  ;;  %s1715_s15 = sphi %s1745_s15, %s14_s15  }
   0x2   : > { %p163_p1 = scmp.lt.s32.totalorder %s1715_s15, 5 }
   0x4   : > { %p164_p2 = pnand %p1684_p0, %p163_p1 }
   0x6   : > { %167 = sbr.rel (%p164_p2) target bundleno = 548 (0x224), region = 36 }
   0xd   : > { %s1685_s17 = sshll.u32 %s1680_s16, 6  ;;  %v1717_v0 = vmov 0  }
   0xe   : > { %1703 = vset.pattern.permute.xlu1 %v1717_v0  ;;  %1702 = vset.pattern.permute.xlu0 %v1717_v0  ;;  %p190_p3 = scmp.lt.s32.totalorder %s1685_s17, 255 }
  0x10   : > { %s3244_s17 = smov (!%p190_p3, %s1685_s17), 255 }
  0x11   : > { %s1686_s18 = sshll.u32 %s3244_s17, 3 }
  0x12   : > { %s1761_s21 = scalar_lea.vmem %s3027_s0, %s1686_s18  ;;  %s2442_s28 = scalar_lea.vmem %s3031_s4, %s1686_s18 }
  0x13   : > { %v1764_v1 = vld [vmem:[%s1761_s21 + $0x10] sm:$0x3f]  ;;  %v1767_v2 = vld [vmem:[%s1761_s21] sm:$0x3f]  ;;  %v1772_v3 = vld [vmem:[%s1761_s21 + $0x18] sm:$0x3f] }
  0x14   : > { %279 = vperm.xlu1 %1703, %v1764_v1   ;;  %269 = vperm.xlu0 %1702, %v1767_v2   ;;  %v1775_v4 = vld [vmem:[%s1761_s21 + $0x8] sm:$0x3f]  ;;  %v1783_v6 = vld [vmem:[%s1761_s21 + $0x20] sm:$0x3f]  ;;  %v1788_v7 = vld [vmem:[%s1761_s21 + $0x38] sm:$0x3f] }
  0x15   : > { %v1780_v5 = vld [vmem:[%s1761_s21 + $0x28] sm:$0x3f]  ;;  %v1791_v8 = vld [vmem:[%s1761_s21 + $0x30] sm:$0x3f]  ;;  %v1799_v10 = vld [vmem:[%s1761_s21 + $0x40] sm:$0x3f] }
  0x16   : > { %v1796_v9 = vld [vmem:[%s1761_s21 + $0x48] sm:$0x3f]  ;;  %v1804_v11 = vld [vmem:[%s1761_s21 + $0x58] sm:$0x3f]  ;;  %v1807_v12 = vld [vmem:[%s1761_s21 + $0x50] sm:$0x3f] }
  0x17   : > { %v1812_v13 = vld [vmem:[%s1761_s21 + $0x68] sm:$0x3f]  ;;  %v1815_v14 = vld [vmem:[%s1761_s21 + $0x60] sm:$0x3f]  ;;  %v1820_v15 = vld [vmem:[%s1761_s21 + $0x78] sm:$0x3f] }
  0x18   : > { %284 = vperm.xlu1 %1703, %v1772_v3   ;;  %274 = vperm.xlu0 %1702, %v1775_v4   ;;  %v1823_v16 = vld [vmem:[%s1761_s21 + $0x70] sm:$0x3f]  ;;  %v1828_v17 = vld [vmem:[%s1761_s21 + $0x88] sm:$0x3f]  ;;  %v1831_v18 = vld [vmem:[%s1761_s21 + $0x80] sm:$0x3f] }
  0x19   : > { %v1836_v19 = vld [vmem:[%s1761_s21 + $0x98] sm:$0x3f]  ;;  %v1839_v20 = vld [vmem:[%s1761_s21 + $0x90] sm:$0x3f]  ;;  %v1844_v21 = vld [vmem:[%s1761_s21 + $0xa8] sm:$0x3f] }
  0x1a   : > { %v1847_v22 = vld [vmem:[%s1761_s21 + $0xa0] sm:$0x3f]  ;;  %v1852_v23 = vld [vmem:[%s1761_s21 + $0xb8] sm:$0x3f]  ;;  %v1855_v24 = vld [vmem:[%s1761_s21 + $0xb0] sm:$0x3f] }
  0x1b   : > { %v1860_v25 = vld [vmem:[%s1761_s21 + $0xc8] sm:$0x3f]  ;;  %v1863_v26 = vld [vmem:[%s1761_s21 + $0xc0] sm:$0x3f]  ;;  %v1868_v27 = vld [vmem:[%s1761_s21 + $0xd8] sm:$0x3f] }
  0x1c   : > { %294 = vperm.xlu1 %1703, %v1780_v5   ;;  %289 = vperm.xlu0 %1702, %v1783_v6   ;;  %v1871_v28 = vld [vmem:[%s1761_s21 + $0xd0] sm:$0x3f]  ;;  %v1876_v29 = vld [vmem:[%s1761_s21 + $0xe8] sm:$0x3f]  ;;  %v1879_v30 = vld [vmem:[%s1761_s21 + $0xe0] sm:$0x3f] }
  0x1d   : > { %v1884_v31 = vld [vmem:[%s1761_s21 + $0xf8] sm:$0x3f]  ;;  %v1887_v32 = vld [vmem:[%s1761_s21 + $0xf0] sm:$0x3f]  ;;  %v1892_v33 = vld [vmem:[%s1761_s21 + $0x108] sm:$0x3f] }
  0x1e   : > { %v1895_v34 = vld [vmem:[%s1761_s21 + $0x100] sm:$0x3f]  ;;  %v1900_v35 = vld [vmem:[%s1761_s21 + $0x118] sm:$0x3f]  ;;  %v1903_v36 = vld [vmem:[%s1761_s21 + $0x110] sm:$0x3f] }
  0x1f   : > { %v1908_v37 = vld [vmem:[%s1761_s21 + $0x128] sm:$0x3f]  ;;  %v1911_v38 = vld [vmem:[%s1761_s21 + $0x120] sm:$0x3f]  ;;  %v1916_v39 = vld [vmem:[%s1761_s21 + $0x138] sm:$0x3f] }
  0x20   : > { %304 = vperm.xlu1 %1703, %v1788_v7   ;;  %299 = vperm.xlu0 %1702, %v1791_v8   ;;  %v1919_v40 = vld [vmem:[%s1761_s21 + $0x130] sm:$0x3f]  ;;  %v1924_v41 = vld [vmem:[%s1761_s21 + $0x148] sm:$0x3f]  ;;  %v1927_v42 = vld [vmem:[%s1761_s21 + $0x140] sm:$0x3f] }
  0x21   : > { %v1932_v43 = vld [vmem:[%s1761_s21 + $0x158] sm:$0x3f]  ;;  %v1935_v44 = vld [vmem:[%s1761_s21 + $0x150] sm:$0x3f]  ;;  %v1940_v45 = vld [vmem:[%s1761_s21 + $0x168] sm:$0x3f] }
  0x22   : > { %v1943_v46 = vld [vmem:[%s1761_s21 + $0x160] sm:$0x3f]  ;;  %v1948_v47 = vld [vmem:[%s1761_s21 + $0x178] sm:$0x3f]  ;;  %v1951_v48 = vld [vmem:[%s1761_s21 + $0x170] sm:$0x3f] }
  0x23   : > { %v1956_v49 = vld [vmem:[%s1761_s21 + $0x188] sm:$0x3f]  ;;  %v1959_v50 = vld [vmem:[%s1761_s21 + $0x180] sm:$0x3f]  ;;  %v1964_v51 = vld [vmem:[%s1761_s21 + $0x198] sm:$0x3f] }
  0x24   : > { %314 = vperm.xlu1 %1703, %v1796_v9   ;;  %309 = vperm.xlu0 %1702, %v1799_v10   ;;  %3049 = vst [vmem:[#allocation2_spill] sm:$0xff] %v1964_v51  ;;  %v1967_v52 = vld [vmem:[%s1761_s21 + $0x190] sm:$0x3f]  ;;  %v1972_v53 = vld [vmem:[%s1761_s21 + $0x1a8] sm:$0x3f] }
  0x25   : > { %3050 = vst [vmem:[#allocation3_spill] sm:$0xff] %v1972_v53  ;;  %v1975_v54 = vld [vmem:[%s1761_s21 + $0x1a0] sm:$0x3f]  ;;  %v1980_v55 = vld [vmem:[%s1761_s21 + $0x1b8] sm:$0x3f] }
  0x26   : > { %3051 = vst [vmem:[#allocation4_spill] sm:$0xff] %v1980_v55  ;;  %v1983_v56 = vld [vmem:[%s1761_s21 + $0x1b0] sm:$0x3f]  ;;  %v1988_v57 = vld [vmem:[%s1761_s21 + $0x1c8] sm:$0x3f] }
  0x27   : > { %3052 = vst [vmem:[#allocation5_spill] sm:$0xff] %v1983_v56  ;;  %3053 = vst [vmem:[#allocation6_spill] sm:$0xff] %v1988_v57  ;;  %v1991_v58 = vld [vmem:[%s1761_s21 + $0x1c0] sm:$0x3f]  ;;  %v1996_v59 = vld [vmem:[%s1761_s21 + $0x1d8] sm:$0x3f] }
  0x28   : > { %324 = vperm.xlu1 %1703, %v1804_v11   ;;  %319 = vperm.xlu0 %1702, %v1807_v12   ;;  %3054 = vst [vmem:[#allocation7_spill] sm:$0xff] %v1991_v58  ;;  %3055 = vst [vmem:[#allocation8_spill] sm:$0xff] %v1996_v59  ;;  %v1999_v60 = vld [vmem:[%s1761_s21 + $0x1d0] sm:$0x3f]  ;;  %v2004_v61 = vld [vmem:[%s1761_s21 + $0x1e8] sm:$0x3f] }
  0x29   : > { %3056 = vst [vmem:[#allocation9_spill] sm:$0xff] %v1999_v60  ;;  %3057 = vst [vmem:[#allocation10_spill] sm:$0xff] %v2004_v61  ;;  %v2007_v62 = vld [vmem:[%s1761_s21 + $0x1e0] sm:$0x3f]  ;;  %v2012_v63 = vld [vmem:[%s1761_s21 + $0x1f8] sm:$0x3f] }
  0x2a   : > { %3058 = vst [vmem:[#allocation11_spill] sm:$0xff] %v2007_v62  ;;  %3059 = vst [vmem:[#allocation12_spill] sm:$0xff] %v2012_v63  ;;  %v2015_v0 = vld [vmem:[%s1761_s21 + $0x1f0] sm:$0x3f] }
  0x2c   : > { %334 = vperm.xlu1 %1703, %v1812_v13   ;;  %329 = vperm.xlu0 %1702, %v1815_v14  }
  0x30   : > { %344 = vperm.xlu1 %1703, %v1820_v15   ;;  %339 = vperm.xlu0 %1702, %v1823_v16  }
  0x34   : > { %354 = vperm.xlu1 %1703, %v1828_v17   ;;  %349 = vperm.xlu0 %1702, %v1831_v18  }
  0x38   : > { %364 = vperm.xlu1 %1703, %v1836_v19   ;;  %359 = vperm.xlu0 %1702, %v1839_v20  }
  0x3c   : > { %374 = vperm.xlu1 %1703, %v1844_v21   ;;  %369 = vperm.xlu0 %1702, %v1847_v22  }
  0x40   : > { %384 = vperm.xlu1 %1703, %v1852_v23   ;;  %379 = vperm.xlu0 %1702, %v1855_v24  }
  0x44   : > { %394 = vperm.xlu1 %1703, %v1860_v25   ;;  %389 = vperm.xlu0 %1702, %v1863_v26  }
  0x48   : > { %404 = vperm.xlu1 %1703, %v1868_v27   ;;  %399 = vperm.xlu0 %1702, %v1871_v28  }
  0x4c   : > { %414 = vperm.xlu1 %1703, %v1876_v29   ;;  %409 = vperm.xlu0 %1702, %v1879_v30  }
  0x50   : > { %424 = vperm.xlu1 %1703, %v1884_v31   ;;  %419 = vperm.xlu0 %1702, %v1887_v32  }
  0x54   : > { %434 = vperm.xlu1 %1703, %v1892_v33   ;;  %429 = vperm.xlu0 %1702, %v1895_v34  }
  0x58   : > { %444 = vperm.xlu1 %1703, %v1900_v35   ;;  %439 = vperm.xlu0 %1702, %v1903_v36  }
  0x5c   : > { %454 = vperm.xlu1 %1703, %v1908_v37   ;;  %449 = vperm.xlu0 %1702, %v1911_v38  }
  0x60   : > { %464 = vperm.xlu1 %1703, %v1916_v39   ;;  %459 = vperm.xlu0 %1702, %v1919_v40  }
  0x64   : > { %474 = vperm.xlu1 %1703, %v1924_v41   ;;  %469 = vperm.xlu0 %1702, %v1927_v42  }
  0x68   : > { %484 = vperm.xlu1 %1703, %v1932_v43   ;;  %479 = vperm.xlu0 %1702, %v1935_v44  }
  0x6c   : > { %494 = vperm.xlu1 %1703, %v1940_v45   ;;  %489 = vperm.xlu0 %1702, %v1943_v46  }
  0x70   : > { %504 = vperm.xlu1 %1703, %v1948_v47   ;;  %499 = vperm.xlu0 %1702, %v1951_v48  }
  0x74   : > { %514 = vperm.xlu1 %1703, %v1956_v49   ;;  %509 = vperm.xlu0 %1702, %v1959_v50  }
  0x78   : > { %524 = vperm.xlu1 %1703, %v1964_v51   ;;  %519 = vperm.xlu0 %1702, %v1967_v52  }
  0x7c   : > { %534 = vperm.xlu1 %1703, %v1972_v53   ;;  %529 = vperm.xlu0 %1702, %v1975_v54  }
  0x80   : > { %544 = vperm.xlu1 %1703, %v1980_v55   ;;  %539 = vperm.xlu0 %1702, %v1983_v56  }
  0x84   : > { %554 = vperm.xlu1 %1703, %v1988_v57   ;;  %549 = vperm.xlu0 %1702, %v1991_v58  }
  0x88   : > { %564 = vperm.xlu1 %1703, %v1996_v59   ;;  %559 = vperm.xlu0 %1702, %v1999_v60   ;;  %v1718_v60 = vmov 1  }
  0x8c   : > { %574 = vperm.xlu1 %1703, %v2004_v61   ;;  %569 = vperm.xlu0 %1702, %v2007_v62  }
  0x90   : > { %584 = vperm.xlu1 %1703, %v2012_v63   ;;  %579 = vperm.xlu0 %1702, %v2015_v0  }
  0x93   : > { %v2019_v57 = vpop.permute.xlu1 %279  ;;  %v2021_v59 = vpop.permute.xlu0 %269 }
  0x94   : > { %3060 = vst [vmem:[#allocation13_spill] sm:$0xff] %v2019_v57  ;;  %3061 = vst [vmem:[#allocation14_spill] sm:$0xff] %v2021_v59  ;;  %1705 = vset.pattern.permute.xlu1 %v1718_v60  ;;  %1704 = vset.pattern.permute.xlu0 %v1718_v60 }
  0x95   : > { %724 = vperm.xlu1 %1705, %v1775_v4   ;;  %720 = vperm.xlu0 %1704, %v1767_v2  }
  0x97   : > { %v2025_v61 = vpop.permute.xlu1 %284  ;;  %v2027_v62 = vpop.permute.xlu0 %274 }
  0x98   : > { %3062 = vst [vmem:[#allocation15_spill] sm:$0xff] %v2025_v61  ;;  %3063 = vst [vmem:[#allocation16_spill] sm:$0xff] %v2027_v62 }
  0x99   : > { %728 = vperm.xlu1 %1705, %v1764_v1   ;;  %732 = vperm.xlu0 %1704, %v1772_v3  }
  0x9b   : > { %v2031_v63 = vpop.permute.xlu1 %294  ;;  %v2033_v57 = vpop.permute.xlu0 %289 }
  0x9c   : > { %3064 = vst [vmem:[#allocation17_spill] sm:$0xff] %v2031_v63  ;;  %3065 = vst [vmem:[#allocation18_spill] sm:$0xff] %v2033_v57 }
  0x9d   : > { %736 = vperm.xlu1 %1705, %v1783_v6   ;;  %740 = vperm.xlu0 %1704, %v1780_v5  }
  0x9f   : > { %v2037_v60 = vpop.permute.xlu1 %304  ;;  %v2039_v59 = vpop.permute.xlu0 %299 }
  0xa0   : > { %3066 = vst [vmem:[#allocation19_spill] sm:$0xff] %v2037_v60  ;;  %3067 = vst [vmem:[#allocation20_spill] sm:$0xff] %v2039_v59 }
  0xa1   : > { %744 = vperm.xlu1 %1705, %v1791_v8   ;;  %748 = vperm.xlu0 %1704, %v1788_v7  }
  0xa3   : > { %v2043_v61 = vpop.permute.xlu1 %314  ;;  %v2045_v62 = vpop.permute.xlu0 %309 }
  0xa4   : > { %3068 = vst [vmem:[#allocation21_spill] sm:$0xff] %v2043_v61  ;;  %3069 = vst [vmem:[#allocation22_spill] sm:$0xff] %v2045_v62 }
  0xa5   : > { %752 = vperm.xlu1 %1705, %v1799_v10   ;;  %756 = vperm.xlu0 %1704, %v1796_v9  }
  0xa7   : > { %v2049_v63 = vpop.permute.xlu1 %324  ;;  %v2051_v57 = vpop.permute.xlu0 %319 }
  0xa8   : > { %3070 = vst [vmem:[#allocation23_spill] sm:$0xff] %v2049_v63  ;;  %3071 = vst [vmem:[#allocation24_spill] sm:$0xff] %v2051_v57 }
  0xa9   : > { %760 = vperm.xlu1 %1705, %v1807_v12   ;;  %764 = vperm.xlu0 %1704, %v1804_v11  }
  0xab   : > { %v2055_v60 = vpop.permute.xlu1 %334  ;;  %v2057_v59 = vpop.permute.xlu0 %329 }
  0xac   : > { %3072 = vst [vmem:[#allocation25_spill] sm:$0xff] %v2055_v60  ;;  %3073 = vst [vmem:[#allocation26_spill] sm:$0xff] %v2057_v59 }
  0xad   : > { %768 = vperm.xlu1 %1705, %v1815_v14   ;;  %772 = vperm.xlu0 %1704, %v1812_v13  }
  0xaf   : > { %v2061_v61 = vpop.permute.xlu1 %344  ;;  %v2063_v62 = vpop.permute.xlu0 %339 }
  0xb0   : > { %3074 = vst [vmem:[#allocation27_spill] sm:$0xff] %v2061_v61  ;;  %3075 = vst [vmem:[#allocation28_spill] sm:$0xff] %v2063_v62 }
  0xb1   : > { %776 = vperm.xlu1 %1705, %v1823_v16   ;;  %780 = vperm.xlu0 %1704, %v1820_v15  }
  0xb3   : > { %v2067_v63 = vpop.permute.xlu1 %354  ;;  %v2069_v57 = vpop.permute.xlu0 %349 }
  0xb4   : > { %3076 = vst [vmem:[#allocation29_spill] sm:$0xff] %v2067_v63  ;;  %3077 = vst [vmem:[#allocation30_spill] sm:$0xff] %v2069_v57 }
  0xb5   : > { %784 = vperm.xlu1 %1705, %v1831_v18   ;;  %788 = vperm.xlu0 %1704, %v1828_v17  }
  0xb7   : > { %v2073_v60 = vpop.permute.xlu1 %364  ;;  %v2075_v59 = vpop.permute.xlu0 %359 }
  0xb8   : > { %3078 = vst [vmem:[#allocation31_spill] sm:$0xff] %v2073_v60  ;;  %3079 = vst [vmem:[#allocation32_spill] sm:$0xff] %v2075_v59 }
  0xb9   : > { %792 = vperm.xlu1 %1705, %v1839_v20   ;;  %796 = vperm.xlu0 %1704, %v1836_v19  }
  0xbb   : > { %v2079_v61 = vpop.permute.xlu1 %374  ;;  %v2081_v62 = vpop.permute.xlu0 %369 }
  0xbc   : > { %3080 = vst [vmem:[#allocation33_spill] sm:$0xff] %v2079_v61  ;;  %3081 = vst [vmem:[#allocation34_spill] sm:$0xff] %v2081_v62 }
  0xbd   : > { %800 = vperm.xlu1 %1705, %v1847_v22   ;;  %804 = vperm.xlu0 %1704, %v1844_v21  }
  0xbf   : > { %v2085_v63 = vpop.permute.xlu1 %384  ;;  %v2087_v57 = vpop.permute.xlu0 %379 }
  0xc0   : > { %3082 = vst [vmem:[#allocation35_spill] sm:$0xff] %v2085_v63  ;;  %3083 = vst [vmem:[#allocation36_spill] sm:$0xff] %v2087_v57 }
  0xc1   : > { %808 = vperm.xlu1 %1705, %v1855_v24   ;;  %812 = vperm.xlu0 %1704, %v1852_v23  }
  0xc3   : > { %v2091_v60 = vpop.permute.xlu1 %394  ;;  %v2093_v59 = vpop.permute.xlu0 %389 }
  0xc4   : > { %3084 = vst [vmem:[#allocation37_spill] sm:$0xff] %v2091_v60  ;;  %3085 = vst [vmem:[#allocation38_spill] sm:$0xff] %v2093_v59 }
  0xc5   : > { %816 = vperm.xlu1 %1705, %v1863_v26   ;;  %820 = vperm.xlu0 %1704, %v1860_v25  }
  0xc7   : > { %v2097_v61 = vpop.permute.xlu1 %404  ;;  %v2099_v62 = vpop.permute.xlu0 %399 }
  0xc8   : > { %3086 = vst [vmem:[#allocation39_spill] sm:$0xff] %v2097_v61  ;;  %3087 = vst [vmem:[#allocation40_spill] sm:$0xff] %v2099_v62 }
  0xc9   : > { %824 = vperm.xlu1 %1705, %v1871_v28   ;;  %828 = vperm.xlu0 %1704, %v1868_v27  }
  0xcb   : > { %v2103_v63 = vpop.permute.xlu1 %414  ;;  %v2105_v57 = vpop.permute.xlu0 %409 }
  0xcc   : > { %3088 = vst [vmem:[#allocation41_spill] sm:$0xff] %v2103_v63  ;;  %3089 = vst [vmem:[#allocation42_spill] sm:$0xff] %v2105_v57 }
  0xcd   : > { %832 = vperm.xlu1 %1705, %v1879_v30   ;;  %836 = vperm.xlu0 %1704, %v1876_v29  }
  0xcf   : > { %v2109_v60 = vpop.permute.xlu1 %424  ;;  %v2111_v59 = vpop.permute.xlu0 %419 }
  0xd0   : > { %3090 = vst [vmem:[#allocation43_spill] sm:$0xff] %v2109_v60  ;;  %3091 = vst [vmem:[#allocation44_spill] sm:$0xff] %v2111_v59 }
  0xd1   : > { %840 = vperm.xlu1 %1705, %v1887_v32   ;;  %844 = vperm.xlu0 %1704, %v1884_v31  }
  0xd3   : > { %v2115_v61 = vpop.permute.xlu1 %434  ;;  %v2117_v62 = vpop.permute.xlu0 %429 }
  0xd4   : > { %3092 = vst [vmem:[#allocation45_spill] sm:$0xff] %v2115_v61  ;;  %3093 = vst [vmem:[#allocation46_spill] sm:$0xff] %v2117_v62 }
  0xd5   : > { %848 = vperm.xlu1 %1705, %v1895_v34   ;;  %852 = vperm.xlu0 %1704, %v1892_v33  }
  0xd7   : > { %v2121_v63 = vpop.permute.xlu1 %444  ;;  %v2123_v57 = vpop.permute.xlu0 %439 }
  0xd8   : > { %3094 = vst [vmem:[#allocation47_spill] sm:$0xff] %v2121_v63  ;;  %3095 = vst [vmem:[#allocation48_spill] sm:$0xff] %v2123_v57 }
  0xd9   : > { %856 = vperm.xlu1 %1705, %v1903_v36   ;;  %860 = vperm.xlu0 %1704, %v1900_v35  }
  0xdb   : > { %v2127_v60 = vpop.permute.xlu1 %454  ;;  %v2129_v59 = vpop.permute.xlu0 %449 }
  0xdc   : > { %3096 = vst [vmem:[#allocation49_spill] sm:$0xff] %v2127_v60  ;;  %3097 = vst [vmem:[#allocation50_spill] sm:$0xff] %v2129_v59 }
  0xdd   : > { %864 = vperm.xlu1 %1705, %v1911_v38   ;;  %868 = vperm.xlu0 %1704, %v1908_v37  }
  0xdf   : > { %v2133_v61 = vpop.permute.xlu1 %464  ;;  %v2135_v62 = vpop.permute.xlu0 %459 }
  0xe0   : > { %3098 = vst [vmem:[#allocation51_spill] sm:$0xff] %v2133_v61  ;;  %3099 = vst [vmem:[#allocation52_spill] sm:$0xff] %v2135_v62 }
  0xe1   : > { %872 = vperm.xlu1 %1705, %v1919_v40   ;;  %876 = vperm.xlu0 %1704, %v1916_v39  }
  0xe3   : > { %v2139_v63 = vpop.permute.xlu1 %474  ;;  %v2141_v57 = vpop.permute.xlu0 %469 }
  0xe4   : > { %3100 = vst [vmem:[#allocation53_spill] sm:$0xff] %v2139_v63  ;;  %3101 = vst [vmem:[#allocation54_spill] sm:$0xff] %v2141_v57 }
  0xe5   : > { %880 = vperm.xlu1 %1705, %v1927_v42   ;;  %884 = vperm.xlu0 %1704, %v1924_v41  }
  0xe7   : > { %v2145_v60 = vpop.permute.xlu1 %484  ;;  %v2147_v59 = vpop.permute.xlu0 %479 }
  0xe8   : > { %3102 = vst [vmem:[#allocation55_spill] sm:$0xff] %v2145_v60  ;;  %3103 = vst [vmem:[#allocation56_spill] sm:$0xff] %v2147_v59 }
  0xe9   : > { %888 = vperm.xlu1 %1705, %v1935_v44   ;;  %892 = vperm.xlu0 %1704, %v1932_v43  }
  0xeb   : > { %v2151_v61 = vpop.permute.xlu1 %494  ;;  %v2153_v62 = vpop.permute.xlu0 %489 }
  0xec   : > { %3104 = vst [vmem:[#allocation57_spill] sm:$0xff] %v2151_v61  ;;  %3105 = vst [vmem:[#allocation58_spill] sm:$0xff] %v2153_v62 }
  0xed   : > { %896 = vperm.xlu1 %1705, %v1943_v46   ;;  %900 = vperm.xlu0 %1704, %v1940_v45  }
  0xef   : > { %v2157_v63 = vpop.permute.xlu1 %504  ;;  %v2159_v57 = vpop.permute.xlu0 %499 }
  0xf0   : > { %3106 = vst [vmem:[#allocation59_spill] sm:$0xff] %v2157_v63  ;;  %3107 = vst [vmem:[#allocation60_spill] sm:$0xff] %v2159_v57 }
  0xf1   : > { %904 = vperm.xlu1 %1705, %v1951_v48   ;;  %908 = vperm.xlu0 %1704, %v1948_v47  }
  0xf3   : > { %v2163_v60 = vpop.permute.xlu1 %514  ;;  %v2165_v59 = vpop.permute.xlu0 %509 }
  0xf4   : > { %3108 = vst [vmem:[#allocation61_spill] sm:$0xff] %v2163_v60  ;;  %3109 = vst [vmem:[#allocation62_spill] sm:$0xff] %v2165_v59 }
  0xf5   : > { %912 = vperm.xlu1 %1705, %v1959_v50   ;;  %916 = vperm.xlu0 %1704, %v1956_v49  }
  0xf7   : > { %v2169_v61 = vpop.permute.xlu1 %524  ;;  %v2171_v62 = vpop.permute.xlu0 %519 }
  0xf8   : > { %3110 = vst [vmem:[#allocation63_spill] sm:$0xff] %v2169_v61  ;;  %3111 = vst [vmem:[#allocation64_spill] sm:$0xff] %v2171_v62 }
  0xf9   : > { %920 = vperm.xlu1 %1705, %v1967_v52   ;;  %924 = vperm.xlu0 %1704, %v1964_v51  }
  0xfb   : > { %v2175_v63 = vpop.permute.xlu1 %534  ;;  %v2177_v57 = vpop.permute.xlu0 %529 }
  0xfc   : > { %3112 = vst [vmem:[#allocation65_spill] sm:$0xff] %v2175_v63  ;;  %3113 = vst [vmem:[#allocation66_spill] sm:$0xff] %v2177_v57  ;;  %v3118_v63 = vld [vmem:[#allocation6_spill] sm:$0xff] }
  0xfd   : > { %928 = vperm.xlu1 %1705, %v1975_v54   ;;  %932 = vperm.xlu0 %1704, %v1972_v53   ;;  %v3121_v53 = vld [vmem:[#allocation9_spill] sm:$0xff] }
  0xff   : > { %v2181_v60 = vpop.permute.xlu1 %544  ;;  %v2183_v59 = vpop.permute.xlu0 %539 }
 0x100   : > { %3114 = vst [vmem:[#allocation67_spill] sm:$0xff] %v2181_v60  ;;  %3115 = vst [vmem:[#allocation68_spill] sm:$0xff] %v2183_v59  ;;  %v3122_v60 = vld [vmem:[#allocation8_spill] sm:$0xff] }
 0x101   : > { %936 = vperm.xlu1 %1705, %v1983_v56   ;;  %940 = vperm.xlu0 %1704, %v1980_v55   ;;  %v3125_v55 = vld [vmem:[#allocation11_spill] sm:$0xff] }
 0x103   : > { %v2187_v61 = vpop.permute.xlu1 %554  ;;  %v2189_v62 = vpop.permute.xlu0 %549 }
 0x104   : > { %3116 = vst [vmem:[#allocation69_spill] sm:$0xff] %v2187_v61  ;;  %3117 = vst [vmem:[#allocation70_spill] sm:$0xff] %v2189_v62  ;;  %v3126_v61 = vld [vmem:[#allocation10_spill] sm:$0xff] }
 0x105   : > { %944 = vperm.xlu1 %1705, %v1991_v58   ;;  %948 = vperm.xlu0 %1704, %v3118_v63  }
 0x107   : > { %v2193_v57 = vpop.permute.xlu1 %564  ;;  %v2195_v51 = vpop.permute.xlu0 %559 }
 0x108   : > { %3119 = vst [vmem:[#allocation71_spill] sm:$0xff] %v2193_v57  ;;  %3120 = vst [vmem:[#allocation72_spill] sm:$0xff] %v2195_v51  ;;  %v3129_v57 = vld [vmem:[#allocation12_spill] sm:$0xff] }
 0x109   : > { %952 = vperm.xlu1 %1705, %v3121_v53   ;;  %956 = vperm.xlu0 %1704, %v3122_v60   ;;  %v1719_v60 = vmov 2  }
 0x10b   : > { %v2199_v59 = vpop.permute.xlu1 %574  ;;  %v2201_v56 = vpop.permute.xlu0 %569 }
 0x10c   : > { %3123 = vst [vmem:[#allocation9_spill] sm:$0xff] %v2199_v59  ;;  %3124 = vst [vmem:[#allocation73_spill] sm:$0xff] %v2201_v56 }
 0x10d   : > { %960 = vperm.xlu1 %1705, %v3125_v55   ;;  %964 = vperm.xlu0 %1704, %v3126_v61  }
 0x10f   : > { %v2205_v62 = vpop.permute.xlu1 %584  ;;  %v2207_v58 = vpop.permute.xlu0 %579 }
 0x110   : > { %3127 = vst [vmem:[#allocation11_spill] sm:$0xff] %v2205_v62  ;;  %3128 = vst [vmem:[#allocation10_spill] sm:$0xff] %v2207_v58 }
 0x111   : > { %968 = vperm.xlu1 %1705, %v2015_v0   ;;  %972 = vperm.xlu0 %1704, %v3129_v57  }
 0x114   : > { %v2211_v51 = vpop.permute.xlu1 %724  ;;  %v2213_v63 = vpop.permute.xlu0 %720 }
 0x115   : > { %1706 = vset.pattern.permute.xlu1 %v1719_v60  ;;  %1707 = vset.pattern.permute.xlu0 %v1719_v60 }
 0x116   : > { %1108 = vperm.xlu1 %1706, %v1767_v2   ;;  %1112 = vperm.xlu0 %1707, %v1775_v4  }
 0x118   : > { %v2217_v59 = vpop.permute.xlu1 %728  ;;  %v2219_v62 = vpop.permute.xlu0 %732 }
 0x11a   : > { %1116 = vperm.xlu1 %1706, %v1764_v1   ;;  %1124 = vperm.xlu0 %1707, %v1783_v6  }
 0x11c   : > { %v2223_v58 = vpop.permute.xlu1 %736  ;;  %v2225_v56 = vpop.permute.xlu0 %740 }
 0x11e   : > { %1120 = vperm.xlu1 %1706, %v1772_v3   ;;  %1132 = vperm.xlu0 %1707, %v1791_v8  }
 0x120   : > { %v2229_v60 = vpop.permute.xlu1 %744  ;;  %v2231_v2 = vpop.permute.xlu0 %748 }
 0x122   : > { %1128 = vperm.xlu1 %1706, %v1780_v5   ;;  %1140 = vperm.xlu0 %1707, %v1799_v10  }
 0x124   : > { %v2235_v4 = vpop.permute.xlu1 %752  ;;  %v2237_v1 = vpop.permute.xlu0 %756 }
 0x126   : > { %1136 = vperm.xlu1 %1706, %v1788_v7   ;;  %1148 = vperm.xlu0 %1707, %v1807_v12  }
 0x128   : > { %v2241_v6 = vpop.permute.xlu1 %760  ;;  %v2243_v3 = vpop.permute.xlu0 %764 }
 0x12a   : > { %1144 = vperm.xlu1 %1706, %v1796_v9   ;;  %1156 = vperm.xlu0 %1707, %v1815_v14  }
 0x12c   : > { %v2247_v8 = vpop.permute.xlu1 %768  ;;  %v2249_v5 = vpop.permute.xlu0 %772 }
 0x12e   : > { %1152 = vperm.xlu1 %1706, %v1804_v11   ;;  %1164 = vperm.xlu0 %1707, %v1823_v16  }
 0x130   : > { %v2253_v10 = vpop.permute.xlu1 %776  ;;  %v2255_v7 = vpop.permute.xlu0 %780 }
 0x132   : > { %1160 = vperm.xlu1 %1706, %v1812_v13   ;;  %1172 = vperm.xlu0 %1707, %v1831_v18  }
 0x134   : > { %v2259_v12 = vpop.permute.xlu1 %784  ;;  %v2261_v9 = vpop.permute.xlu0 %788 }
 0x136   : > { %1168 = vperm.xlu1 %1706, %v1820_v15   ;;  %1180 = vperm.xlu0 %1707, %v1839_v20  }
 0x138   : > { %v2265_v14 = vpop.permute.xlu1 %792  ;;  %v2267_v11 = vpop.permute.xlu0 %796 }
 0x13a   : > { %1176 = vperm.xlu1 %1706, %v1828_v17   ;;  %1188 = vperm.xlu0 %1707, %v1847_v22  }
 0x13c   : > { %v2271_v16 = vpop.permute.xlu1 %800  ;;  %v2273_v13 = vpop.permute.xlu0 %804 }
 0x13e   : > { %1184 = vperm.xlu1 %1706, %v1836_v19   ;;  %1196 = vperm.xlu0 %1707, %v1855_v24  }
 0x140   : > { %v2277_v18 = vpop.permute.xlu1 %808  ;;  %v2279_v15 = vpop.permute.xlu0 %812 }
 0x142   : > { %1192 = vperm.xlu1 %1706, %v1844_v21   ;;  %1204 = vperm.xlu0 %1707, %v1863_v26  }
 0x144   : > { %v2283_v20 = vpop.permute.xlu1 %816  ;;  %v2285_v17 = vpop.permute.xlu0 %820 }
 0x146   : > { %1200 = vperm.xlu1 %1706, %v1852_v23   ;;  %1212 = vperm.xlu0 %1707, %v1871_v28  }
 0x148   : > { %v2289_v22 = vpop.permute.xlu1 %824  ;;  %v2291_v19 = vpop.permute.xlu0 %828 }
 0x14a   : > { %1208 = vperm.xlu1 %1706, %v1860_v25   ;;  %1220 = vperm.xlu0 %1707, %v1879_v30  }
 0x14c   : > { %v2295_v24 = vpop.permute.xlu1 %832  ;;  %v2297_v21 = vpop.permute.xlu0 %836 }
 0x14e   : > { %1216 = vperm.xlu1 %1706, %v1868_v27   ;;  %1228 = vperm.xlu0 %1707, %v1887_v32  }
 0x150   : > { %v2301_v26 = vpop.permute.xlu1 %840  ;;  %v2303_v23 = vpop.permute.xlu0 %844 }
 0x152   : > { %1224 = vperm.xlu1 %1706, %v1876_v29   ;;  %1236 = vperm.xlu0 %1707, %v1895_v34  }
 0x154   : > { %v2307_v28 = vpop.permute.xlu1 %848  ;;  %v2309_v25 = vpop.permute.xlu0 %852 }
 0x156   : > { %1232 = vperm.xlu1 %1706, %v1884_v31   ;;  %1244 = vperm.xlu0 %1707, %v1903_v36  }
 0x158   : > { %v2313_v30 = vpop.permute.xlu1 %856  ;;  %v2315_v27 = vpop.permute.xlu0 %860 }
 0x15a   : > { %1240 = vperm.xlu1 %1706, %v1892_v33   ;;  %1252 = vperm.xlu0 %1707, %v1911_v38  }
 0x15c   : > { %v2319_v32 = vpop.permute.xlu1 %864  ;;  %v2321_v29 = vpop.permute.xlu0 %868 }
 0x15e   : > { %1248 = vperm.xlu1 %1706, %v1900_v35   ;;  %1260 = vperm.xlu0 %1707, %v1919_v40  }
 0x160   : > { %v2325_v34 = vpop.permute.xlu1 %872  ;;  %v2327_v31 = vpop.permute.xlu0 %876 }
 0x162   : > { %1256 = vperm.xlu1 %1706, %v1908_v37   ;;  %1268 = vperm.xlu0 %1707, %v1927_v42  }
 0x164   : > { %v2331_v36 = vpop.permute.xlu1 %880  ;;  %v2333_v33 = vpop.permute.xlu0 %884 }
 0x166   : > { %1264 = vperm.xlu1 %1706, %v1916_v39   ;;  %1276 = vperm.xlu0 %1707, %v1935_v44  }
 0x168   : > { %v2337_v38 = vpop.permute.xlu1 %888  ;;  %v2339_v35 = vpop.permute.xlu0 %892 }
 0x169   : > { %3130 = vst [vmem:[#allocation12_spill] sm:$0xff] %v2339_v35 }
 0x16a   : > { %1272 = vperm.xlu1 %1706, %v1924_v41   ;;  %1284 = vperm.xlu0 %1707, %v1943_v46  }
 0x16c   : > { %v2343_v40 = vpop.permute.xlu1 %896  ;;  %v2345_v37 = vpop.permute.xlu0 %900 }
 0x16d   : > { %3131 = vst [vmem:[#allocation74_spill] sm:$0xff] %v2343_v40  ;;  %3132 = vst [vmem:[#allocation75_spill] sm:$0xff] %v2345_v37  ;;  %v3157_v37 = vld [vmem:[#allocation14_spill] sm:$0xff] }
 0x16e   : > { %1280 = vperm.xlu1 %1706, %v1932_v43   ;;  %1292 = vperm.xlu0 %1707, %v1951_v48  }
 0x170   : > { %v2349_v42 = vpop.permute.xlu1 %904  ;;  %v2351_v39 = vpop.permute.xlu0 %908 }
 0x171   : > { %3133 = vst [vmem:[#allocation76_spill] sm:$0xff] %v2349_v42  ;;  %3134 = vst [vmem:[#allocation77_spill] sm:$0xff] %v2351_v39  ;;  %v3142_v39 = vld [vmem:[#allocation5_spill] sm:$0xff] }
 0x172   : > { %1288 = vperm.xlu1 %1706, %v1940_v45   ;;  %1300 = vperm.xlu0 %1707, %v1959_v50   ;;  %v3141_v50 = vld [vmem:[#allocation2_spill] sm:$0xff] }
 0x174   : > { %v2355_v44 = vpop.permute.xlu1 %912  ;;  %v2357_v41 = vpop.permute.xlu0 %916 }
 0x175   : > { %3135 = vst [vmem:[#allocation78_spill] sm:$0xff] %v2355_v44  ;;  %3136 = vst [vmem:[#allocation79_spill] sm:$0xff] %v2357_v41  ;;  %v3149_v44 = vld [vmem:[#allocation4_spill] sm:$0xff] }
 0x176   : > { %1296 = vperm.xlu1 %1706, %v1948_v47   ;;  %1308 = vperm.xlu0 %1707, %v1967_v52   ;;  %v587_v52 = vlaneseq }
 0x178   : > { %v2361_v46 = vpop.permute.xlu1 %920  ;;  %v2363_v43 = vpop.permute.xlu0 %924 }
 0x179   : > { %3137 = vst [vmem:[#allocation80_spill] sm:$0xff] %v2361_v46  ;;  %3138 = vst [vmem:[#allocation81_spill] sm:$0xff] %v2363_v43  ;;  %v3145_v46 = vld [vmem:[#allocation3_spill] sm:$0xff] }
 0x17a   : > { %1304 = vperm.xlu1 %1706, %v1956_v49   ;;  %1316 = vperm.xlu0 %1707, %v1975_v54   ;;  %v3146_v43 = vld [vmem:[#allocation7_spill] sm:$0xff] }
 0x17c   : > { %v2367_v48 = vpop.permute.xlu1 %928  ;;  %v2369_v45 = vpop.permute.xlu0 %932 }
 0x17d   : > { %3139 = vst [vmem:[#allocation82_spill] sm:$0xff] %v2367_v48  ;;  %3140 = vst [vmem:[#allocation83_spill] sm:$0xff] %v2369_v45  ;;  %v588_v48 = vshrl.u32 %v587_v52, 7 }
 0x17e   : > { %1312 = vperm.xlu1 %1706, %v3141_v50   ;;  %1324 = vperm.xlu0 %1707, %v3142_v39  }
 0x17f   : > { %v589_v45 = vsub.s32 0, %v588_v48 }
 0x180   : > { %v2373_v41 = vpop.permute.xlu1 %936  ;;  %v2375_v47 = vpop.permute.xlu0 %940 }
 0x181   : > { %3143 = vst [vmem:[#allocation2_spill] sm:$0xff] %v2373_v41  ;;  %3144 = vst [vmem:[#allocation5_spill] sm:$0xff] %v2375_v47  ;;  %v977_v47 = vsub.s32 1, %v588_v48 }
 0x182   : > { %1320 = vperm.xlu1 %1706, %v3145_v46   ;;  %1332 = vperm.xlu0 %1707, %v3146_v43   ;;  %v265_v46 = vld [vmem:[%s3028_s1] sm:$0x7] }
 0x183   : > { %v3152_v43 = vld [vmem:[#allocation6_spill] sm:$0xff] }
 0x184   : > { %v2379_v49 = vpop.permute.xlu1 %944  ;;  %v2381_v54 = vpop.permute.xlu0 %948 }
 0x185   : > { %3147 = vst [vmem:[#allocation3_spill] sm:$0xff] %v2379_v49  ;;  %3148 = vst [vmem:[#allocation7_spill] sm:$0xff] %v2381_v54  ;;  %v3156_v49 = vld [vmem:[#allocation16_spill] sm:$0xff] }
 0x186   : > { %1328 = vperm.xlu1 %1706, %v3149_v44   ;;  %1340 = vperm.xlu0 %1707, %v3121_v53   ;;  %v2398_v44 = vrot.slane %v265_v46, %v589_v45  ;;  %v2400_v53 = vrot.slane %v265_v46, %v977_v47  ;;  %v2417_v47 = vld [vmem:[%s3030_s3] sm:$0x3f] }
 0x188   : > { %v2385_v50 = vpop.permute.xlu1 %952  ;;  %v2387_v39 = vpop.permute.xlu0 %956  ;;  %v592_v41 = vmul.f32 %v2398_v44, %v3156_v49  ;;  %v980_v45 = vmul.f32 %v2400_v53, %v2211_v51  ;;  %v981_v42 = vmul.f32 %v2400_v53, %v2217_v59 }
 0x189   : > { %3150 = vst [vmem:[#allocation4_spill] sm:$0xff] %v2385_v50  ;;  %3151 = vst [vmem:[#allocation84_spill] sm:$0xff] %v2387_v39  ;;  %v3155_v50 = vld [vmem:[#allocation8_spill] sm:$0xff]  ;;  %v1365_v39 = vsub.s32 2, %v588_v48 }
 0x18a   : > { %1336 = vperm.xlu1 %1706, %v3152_v43   ;;  %1348 = vperm.xlu0 %1707, %v3125_v55   ;;  %v591_v43 = vmul.f32 %v2398_v44, %v3157_v37  ;;  %v3160_v37 = vld [vmem:[#allocation13_spill] sm:$0xff] }
 0x18b   : > { %v2422_v48 = vrot.slane %v265_v46, %v1365_v39  ;;  %v593_v49 = vmul.f32 %v2398_v44, %v3160_v37  ;;  %v2458_v37 = vmul.f32 %v2400_v53, %v2219_v62 }
 0x18c   : > { %v2394_v54 = vpop.permute.xlu1 %960  ;;  %v2396_v52 = vpop.permute.xlu0 %964  ;;  %v655_v51 = vadd.f32 %v591_v43, %v2417_v47 }
 0x18d   : > { %3153 = vst [vmem:[#allocation6_spill] sm:$0xff] %v2394_v54  ;;  %3154 = vst [vmem:[#allocation85_spill] sm:$0xff] %v2396_v52  ;;  %v657_v59 = vadd.f32 %v593_v49, %v2417_v47 }
 0x18e   : > { %1344 = vperm.xlu1 %1706, %v3155_v50   ;;  %1356 = vperm.xlu0 %1707, %v2015_v0   ;;  %v979_v0 = vmul.f32 %v2400_v53, %v2213_v63  ;;  %v656_v50 = vadd.f32 %v592_v41, %v2417_v47  ;;  %v3162_v41 = vld [vmem:[#allocation15_spill] sm:$0xff] }
 0x190   : > { %v2408_v55 = vpop.permute.xlu1 %968  ;;  %v2410_v54 = vpop.permute.xlu0 %972  ;;  %v1043_v40 = vadd.f32 %v979_v0, %v655_v51  ;;  %v2454_v0 = vadd.f32 %v981_v42, %v657_v59  ;;  %v2469_v42 = vmul.f32 %v2400_v53, %v2229_v60  ;;  %v3164_v51 = vld [vmem:[#allocation17_spill] sm:$0xff] }
 0x191   : > { %3158 = vst [vmem:[#allocation8_spill] sm:$0xff] %v2408_v55  ;;  %3159 = vst [vmem:[#allocation16_spill] sm:$0xff] %v2410_v54  ;;  %v3161_v54 = vld [vmem:[#allocation18_spill] sm:$0xff]  ;;  %v1044_v55 = vadd.f32 %v980_v45, %v656_v50 }
 0x192   : > { %1352 = vperm.xlu1 %1706, %v3126_v61   ;;  %v595_v52 = vmul.f32 %v2398_v44, %v3161_v54  ;;  %v983_v61 = vmul.f32 %v2400_v53, %v2223_v58  ;;  %v2447_v54 = vmul.f32 %v2398_v44, %v3162_v41  ;;  %v2463_v50 = vld [vmem:[%s3029_s2] sm:$0x1] }
 0x193   : > { %1560 = vst [vmem:[%s2442_s28] sm:$0x1] %v2463_v50  ;;  %1561 = vst [vmem:[%s2442_s28 + $0x8] sm:$0x1] %v2463_v50 }
 0x194   : > { %v659_v58 = vadd.f32 %v595_v52, %v2417_v47  ;;  %1562 = vst [vmem:[%s2442_s28 + $0x10] sm:$0x1] %v2463_v50  ;;  %1563 = vst [vmem:[%s2442_s28 + $0x18] sm:$0x1] %v2463_v50  ;;  %v658_v60 = vadd.f32 %v2447_v54, %v2417_v47  ;;  %v984_v54 = vmul.f32 %v2400_v53, %v2225_v56 }
 0x195   : > { %v1109_v63 = vpop.permute.xlu1 %1108  ;;  %v1113_v35 = vpop.permute.xlu0 %1112  ;;  %1564 = vst [vmem:[%s2442_s28 + $0x20] sm:$0x1] %v2463_v50  ;;  %1565 = vst [vmem:[%s2442_s28 + $0x28] sm:$0x1] %v2463_v50 }
 0x196   : > { %v1367_v39 = vmul.f32 %v2422_v48, %v1109_v63  ;;  %v1368_v46 = vmul.f32 %v2422_v48, %v1113_v35  ;;  %1360 = vperm.xlu1 %1706, %v3129_v57   ;;  %v3163_v35 = vld [vmem:[#allocation20_spill] sm:$0xff]  ;;  %1566 = vst [vmem:[%s2442_s28 + $0x30] sm:$0x1] %v2463_v50  ;;  %1567 = vst [vmem:[%s2442_s28 + $0x38] sm:$0x1] %v2463_v50  ;;  %v596_v63 = vmul.f32 %v2398_v44, %v3164_v51 }
 0x197   : > { %v2452_v57 = vmul.f32 %v2398_v44, %v3163_v35  ;;  %1568 = vst [vmem:[%s2442_s28 + $0x40] sm:$0x1] %v2463_v50  ;;  %1569 = vst [vmem:[%s2442_s28 + $0x48] sm:$0x1] %v2463_v50 }
 0x198   : > { %v1431_v43 = vadd.f32 %v1367_v39, %v1043_v40  ;;  %v1432_v45 = vadd.f32 %v1368_v46, %v1044_v55  ;;  %v2465_v40 = vadd.f32 %v983_v61, %v659_v58  ;;  %1570 = vst [vmem:[%s2442_s28 + $0x50] sm:$0x1] %v2463_v50  ;;  %1571 = vst [vmem:[%s2442_s28 + $0x58] sm:$0x1] %v2463_v50  ;;  %v3165_v39 = vld [vmem:[#allocation22_spill] sm:$0xff] }
 0x199   : > { %v1117_v49 = vpop.permute.xlu1 %1116  ;;  %v1125_v52 = vpop.permute.xlu0 %1124  ;;  %1572 = vst [vmem:[%s2442_s28 + $0x60] sm:$0x1] %v2463_v50  ;;  %1573 = vst [vmem:[%s2442_s28 + $0x68] sm:$0x1] %v2463_v50  ;;  %v661_v61 = vadd.f32 %v2452_v57, %v2417_v47  ;;  %v599_v46 = vmul.f32 %v2398_v44, %v3165_v39  ;;  %v1046_v58 = vadd.f32 %v2458_v37, %v658_v60 }
 0x19a   : > { %1495 = vst [vmem:[%s2442_s28 + $0x1] sm:$0x3f] %v1431_v43  ;;  %1496 = vst [vmem:[%s2442_s28 + $0x9] sm:$0x3f] %v1432_v45  ;;  %v2474_v62 = vmul.f32 %v2422_v48, %v1117_v49  ;;  %v2477_v55 = vmul.f32 %v2422_v48, %v1125_v52  ;;  %v987_v57 = vmul.f32 %v2400_v53, %v2235_v4  ;;  %v3166_v52 = vld [vmem:[#allocation19_spill] sm:$0xff] }
 0x19b   : > { %1574 = vst [vmem:[%s2442_s28 + $0x70] sm:$0x1] %v2463_v50  ;;  %1575 = vst [vmem:[%s2442_s28 + $0x78] sm:$0x1] %v2463_v50  ;;  %v1049_v45 = vadd.f32 %v2469_v42, %v661_v61  ;;  %v660_v37 = vadd.f32 %v596_v63, %v2417_v47  ;;  %v598_v56 = vmul.f32 %v2398_v44, %v3166_v52 }
 0x19c   : > { %1576 = vst [vmem:[%s2442_s28 + $0x80] sm:$0x1] %v2463_v50  ;;  %1577 = vst [vmem:[%s2442_s28 + $0x88] sm:$0x1] %v2463_v50  ;;  %v1433_v59 = vadd.f32 %v2474_v62, %v2454_v0  ;;  %v1435_v41 = vadd.f32 %v2477_v55, %v2465_v40  ;;  %v3167_v40 = vld [vmem:[#allocation24_spill] sm:$0xff]  ;;  %v986_v60 = vmul.f32 %v2400_v53, %v2231_v2 }
 0x19d   : > { %1578 = vst [vmem:[%s2442_s28 + $0x90] sm:$0x1] %v2463_v50  ;;  %1579 = vst [vmem:[%s2442_s28 + $0x98] sm:$0x1] %v2463_v50  ;;  %v1121_v35 = vpop.permute.xlu1 %1120  ;;  %v1133_v43 = vpop.permute.xlu0 %1132  ;;  %v601_v42 = vmul.f32 %v2398_v44, %v3167_v40  ;;  %v1048_v55 = vadd.f32 %v984_v54, %v660_v37  ;;  %v989_v63 = vmul.f32 %v2400_v53, %v2241_v6 }
 0x19e   : > { %1580 = vst [vmem:[%s2442_s28 + $0xa0] sm:$0x1] %v2463_v50  ;;  %1581 = vst [vmem:[%s2442_s28 + $0xa8] sm:$0x1] %v2463_v50  ;;  %v1370_v0 = vmul.f32 %v2422_v48, %v1121_v35  ;;  %v1373_v49 = vmul.f32 %v2422_v48, %v1133_v43  ;;  %v3169_v35 = vld [vmem:[#allocation26_spill] sm:$0xff] }
 0x19f   : > { %1582 = vst [vmem:[%s2442_s28 + $0xb0] sm:$0x1] %v2463_v50  ;;  %1583 = vst [vmem:[%s2442_s28 + $0xb8] sm:$0x1] %v2463_v50  ;;  %v665_v2 = vadd.f32 %v601_v42, %v2417_v47  ;;  %v603_v43 = vmul.f32 %v2398_v44, %v3169_v35  ;;  %v3172_v35 = vld [vmem:[#allocation25_spill] sm:$0xff] }
 0x1a0   : > { %1584 = vst [vmem:[%s2442_s28 + $0xc0] sm:$0x1] %v2463_v50  ;;  %1585 = vst [vmem:[%s2442_s28 + $0xc8] sm:$0x1] %v2463_v50  ;;  %v1434_v62 = vadd.f32 %v1370_v0, %v1046_v58  ;;  %v1437_v4 = vadd.f32 %v1373_v49, %v1049_v45  ;;  %v3168_v58 = vld [vmem:[#allocation21_spill] sm:$0xff]  ;;  %v988_v0 = vmul.f32 %v2400_v53, %v2237_v1 }
 0x1a1   : > { %1586 = vst [vmem:[%s2442_s28 + $0xd0] sm:$0x1] %v2463_v50  ;;  %1587 = vst [vmem:[%s2442_s28 + $0xd8] sm:$0x1] %v2463_v50  ;;  %v1129_v51 = vpop.permute.xlu1 %1128  ;;  %v1141_v61 = vpop.permute.xlu0 %1140  ;;  %v600_v54 = vmul.f32 %v2398_v44, %v3168_v58  ;;  %v1053_v52 = vadd.f32 %v989_v63, %v665_v2  ;;  %v667_v1 = vadd.f32 %v603_v43, %v2417_v47 }
 0x1a2   : > { %1588 = vst [vmem:[%s2442_s28 + $0xe0] sm:$0x1] %v2463_v50  ;;  %1589 = vst [vmem:[%s2442_s28 + $0xe8] sm:$0x1] %v2463_v50  ;;  %v604_v43 = vmul.f32 %v2398_v44, %v3172_v35 }
 0x1a3   : > { %1590 = vst [vmem:[%s2442_s28 + $0xf0] sm:$0x1] %v2463_v50  ;;  %1591 = vst [vmem:[%s2442_s28 + $0xf8] sm:$0x1] %v2463_v50  ;;  %v664_v42 = vadd.f32 %v600_v54, %v2417_v47 }
 0x1a4   : > { %1592 = vst [vmem:[%s2442_s28 + $0x100] sm:$0x1] %v2463_v50  ;;  %1593 = vst [vmem:[%s2442_s28 + $0x108] sm:$0x1] %v2463_v50 }
 0x1a5   : > { %1594 = vst [vmem:[%s2442_s28 + $0x110] sm:$0x1] %v2463_v50  ;;  %1595 = vst [vmem:[%s2442_s28 + $0x118] sm:$0x1] %v2463_v50  ;;  %v1137_v49 = vpop.permute.xlu1 %1136  ;;  %v1149_v37 = vpop.permute.xlu0 %1148 }
 0x1a6   : > { %1596 = vst [vmem:[%s2442_s28 + $0x120] sm:$0x1] %v2463_v50  ;;  %1597 = vst [vmem:[%s2442_s28 + $0x128] sm:$0x1] %v2463_v50  ;;  %v1377_v40 = vmul.f32 %v2422_v48, %v1149_v37 }
 0x1a7   : > { %1598 = vst [vmem:[%s2442_s28 + $0x130] sm:$0x1] %v2463_v50  ;;  %1599 = vst [vmem:[%s2442_s28 + $0x138] sm:$0x1] %v2463_v50 }
 0x1a8   : > { %1600 = vst [vmem:[%s2442_s28 + $0x140] sm:$0x1] %v2463_v50  ;;  %1601 = vst [vmem:[%s2442_s28 + $0x148] sm:$0x1] %v2463_v50 }
 0x1a9   : > { %1602 = vst [vmem:[%s2442_s28 + $0x150] sm:$0x1] %v2463_v50  ;;  %1603 = vst [vmem:[%s2442_s28 + $0x158] sm:$0x1] %v2463_v50  ;;  %v1145_v63 = vpop.permute.xlu1 %1144 }
 0x1aa   : > { %1604 = vst [vmem:[%s2442_s28 + $0x160] sm:$0x1] %v2463_v50  ;;  %1605 = vst [vmem:[%s2442_s28 + $0x168] sm:$0x1] %v2463_v50  ;;  %v1376_v58 = vmul.f32 %v2422_v48, %v1145_v63 }
 0x1ab   : > { %1606 = vst [vmem:[%s2442_s28 + $0x170] sm:$0x1] %v2463_v50  ;;  %1607 = vst [vmem:[%s2442_s28 + $0x178] sm:$0x1] %v2463_v50 }
 0x1ac   : > { %1608 = vst [vmem:[%s2442_s28 + $0x180] sm:$0x1] %v2463_v50  ;;  %1609 = vst [vmem:[%s2442_s28 + $0x188] sm:$0x1] %v2463_v50 }
 0x1ad   : > { %1610 = vst [vmem:[%s2442_s28 + $0x190] sm:$0x1] %v2463_v50  ;;  %1611 = vst [vmem:[%s2442_s28 + $0x198] sm:$0x1] %v2463_v50  ;;  %v1153_v37 = vpop.permute.xlu1 %1152 }
 0x1ae   : > { %1612 = vst [vmem:[%s2442_s28 + $0x1a0] sm:$0x1] %v2463_v50  ;;  %1613 = vst [vmem:[%s2442_s28 + $0x1a8] sm:$0x1] %v2463_v50 }
 0x1af   : > { %1614 = vst [vmem:[%s2442_s28 + $0x1b0] sm:$0x1] %v2463_v50  ;;  %1615 = vst [vmem:[%s2442_s28 + $0x1b8] sm:$0x1] %v2463_v50 }
 0x1b0   : > { %1616 = vst [vmem:[%s2442_s28 + $0x1c0] sm:$0x1] %v2463_v50  ;;  %1617 = vst [vmem:[%s2442_s28 + $0x1c8] sm:$0x1] %v2463_v50 }
 0x1b1   : > { %1618 = vst [vmem:[%s2442_s28 + $0x1d0] sm:$0x1] %v2463_v50  ;;  %1619 = vst [vmem:[%s2442_s28 + $0x1d8] sm:$0x1] %v2463_v50 }
 0x1b2   : > { %1620 = vst [vmem:[%s2442_s28 + $0x1e0] sm:$0x1] %v2463_v50  ;;  %1621 = vst [vmem:[%s2442_s28 + $0x1e8] sm:$0x1] %v2463_v50 }
 0x1b3   : > { %1622 = vst [vmem:[%s2442_s28 + $0x1f0] sm:$0x1] %v2463_v50  ;;  %1623 = vst [vmem:[%s2442_s28 + $0x1f8] sm:$0x1] %v2463_v50  ;;  %v663_v50 = vadd.f32 %v599_v46, %v2417_v47  ;;  %v1372_v46 = vmul.f32 %v2422_v48, %v1129_v51 }
 0x1b4   : > { %1497 = vst [vmem:[%s2442_s28 + $0x11] sm:$0x3f] %v1433_v59  ;;  %1499 = vst [vmem:[%s2442_s28 + $0x21] sm:$0x3f] %v1435_v41  ;;  %v1375_v59 = vmul.f32 %v2422_v48, %v1141_v61  ;;  %v662_v41 = vadd.f32 %v598_v56, %v2417_v47  ;;  %v991_v56 = vmul.f32 %v2400_v53, %v2247_v8 }
 0x1b5   : > { %v1051_v39 = vadd.f32 %v987_v57, %v663_v50  ;;  %1498 = vst [vmem:[%s2442_s28 + $0x19] sm:$0x3f] %v1434_v62  ;;  %1501 = vst [vmem:[%s2442_s28 + $0x31] sm:$0x3f] %v1437_v4  ;;  %v1436_v45 = vadd.f32 %v1372_v46, %v1048_v55  ;;  %v1374_v50 = vmul.f32 %v2422_v48, %v1137_v49  ;;  %v3170_v62 = vld [vmem:[#allocation23_spill] sm:$0xff]  ;;  %v3171_v55 = vld [vmem:[#allocation28_spill] sm:$0xff]  ;;  %v1157_v46 = vpop.permute.xlu0 %1156 }
 0x1b6   : > { %v1050_v57 = vadd.f32 %v986_v60, %v662_v41  ;;  %v602_v4 = vmul.f32 %v2398_v44, %v3170_v62  ;;  %v605_v60 = vmul.f32 %v2398_v44, %v3171_v55  ;;  %v1441_v8 = vadd.f32 %v1377_v40, %v1053_v52  ;;  %v3175_v55 = vld [vmem:[#allocation32_spill] sm:$0xff] }
 0x1b7   : > { %v1439_v6 = vadd.f32 %v1375_v59, %v1051_v39  ;;  %1500 = vst [vmem:[%s2442_s28 + $0x29] sm:$0x3f] %v1436_v45  ;;  %v1052_v61 = vadd.f32 %v988_v0, %v664_v42  ;;  %v990_v39 = vmul.f32 %v2400_v53, %v2243_v3  ;;  %v1055_v59 = vadd.f32 %v991_v56, %v667_v1  ;;  %v3173_v45 = vld [vmem:[#allocation30_spill] sm:$0xff] }
 0x1b8   : > { %v1438_v51 = vadd.f32 %v1374_v50, %v1050_v57  ;;  %v993_v41 = vmul.f32 %v2400_v53, %v2253_v10  ;;  %1505 = vst [vmem:[%s2442_s28 + $0x51] sm:$0x3f] %v1441_v8  ;;  %v1379_v54 = vmul.f32 %v2422_v48, %v1157_v46  ;;  %v666_v2 = vadd.f32 %v602_v4, %v2417_v47  ;;  %v3174_v4 = vld [vmem:[#allocation27_spill] sm:$0xff] }
 0x1b9   : > { %1503 = vst [vmem:[%s2442_s28 + $0x41] sm:$0x3f] %v1439_v6  ;;  %v669_v3 = vadd.f32 %v605_v60, %v2417_v47  ;;  %v607_v6 = vmul.f32 %v2398_v44, %v3173_v45  ;;  %v1440_v57 = vadd.f32 %v1376_v58, %v1052_v61  ;;  %v992_v49 = vmul.f32 %v2400_v53, %v2249_v5  ;;  %v1165_v52 = vpop.permute.xlu0 %1164 }
 0x1ba   : > { %1502 = vst [vmem:[%s2442_s28 + $0x39] sm:$0x3f] %v1438_v51  ;;  %v1443_v10 = vadd.f32 %v1379_v54, %v1055_v59  ;;  %v1054_v0 = vadd.f32 %v990_v39, %v666_v2  ;;  %v995_v50 = vmul.f32 %v2400_v53, %v2259_v12  ;;  %v1378_v40 = vmul.f32 %v2422_v48, %v1153_v37  ;;  %v1161_v39 = vpop.permute.xlu1 %1160  ;;  %v3176_v2 = vld [vmem:[#allocation29_spill] sm:$0xff] }
 0x1bb   : > { %v1057_v56 = vadd.f32 %v993_v41, %v669_v3  ;;  %1504 = vst [vmem:[%s2442_s28 + $0x49] sm:$0x3f] %v1440_v57  ;;  %v1381_v42 = vmul.f32 %v2422_v48, %v1165_v52  ;;  %v668_v62 = vadd.f32 %v604_v43, %v2417_v47  ;;  %v606_v1 = vmul.f32 %v2398_v44, %v3174_v4  ;;  %v3177_v43 = vld [vmem:[#allocation34_spill] sm:$0xff] }
 0x1bc   : > { %1507 = vst [vmem:[%s2442_s28 + $0x61] sm:$0x3f] %v1443_v10  ;;  %v671_v5 = vadd.f32 %v607_v6, %v2417_v47  ;;  %v609_v60 = vmul.f32 %v2398_v44, %v3175_v55  ;;  %v1442_v51 = vadd.f32 %v1378_v40, %v1054_v0  ;;  %v994_v61 = vmul.f32 %v2400_v53, %v2255_v7  ;;  %v3178_v40 = vld [vmem:[#allocation31_spill] sm:$0xff] }
 0x1bd   : > { %v1445_v12 = vadd.f32 %v1381_v42, %v1057_v56  ;;  %v1056_v8 = vadd.f32 %v992_v49, %v668_v62  ;;  %v1173_v63 = vpop.permute.xlu0 %1172  ;;  %v997_v59 = vmul.f32 %v2400_v53, %v2265_v14  ;;  %v1380_v41 = vmul.f32 %v2422_v48, %v1161_v39  ;;  %v3179_v62 = vld [vmem:[#allocation36_spill] sm:$0xff] }
 0x1be   : > { %v1059_v46 = vadd.f32 %v995_v50, %v671_v5  ;;  %1506 = vst [vmem:[%s2442_s28 + $0x59] sm:$0x3f] %v1442_v51  ;;  %v1383_v58 = vmul.f32 %v2422_v48, %v1173_v63  ;;  %v670_v54 = vadd.f32 %v606_v1, %v2417_v47  ;;  %v608_v35 = vmul.f32 %v2398_v44, %v3176_v2  ;;  %v1169_v10 = vpop.permute.xlu1 %1168 }
 0x1bf   : > { %1509 = vst [vmem:[%s2442_s28 + $0x71] sm:$0x3f] %v1445_v12  ;;  %v673_v7 = vadd.f32 %v609_v60, %v2417_v47  ;;  %v611_v3 = vmul.f32 %v2398_v44, %v3177_v43  ;;  %v1444_v45 = vadd.f32 %v1380_v41, %v1056_v8  ;;  %v996_v57 = vmul.f32 %v2400_v53, %v2261_v9  ;;  %v3181_v41 = vld [vmem:[#allocation38_spill] sm:$0xff] }
 0x1c0   : > { %v1447_v14 = vadd.f32 %v1383_v58, %v1059_v46  ;;  %v1058_v6 = vadd.f32 %v994_v61, %v670_v54  ;;  %v999_v37 = vmul.f32 %v2400_v53, %v2271_v16  ;;  %v1382_v52 = vmul.f32 %v2422_v48, %v1169_v10  ;;  %v3180_v46 = vld [vmem:[#allocation33_spill] sm:$0xff]  ;;  %v3182_v10 = vld [vmem:[#allocation35_spill] sm:$0xff] }
 0x1c1   : > { %v1181_v0 = vpop.permute.xlu0 %1180  ;;  %v1061_v49 = vadd.f32 %v997_v59, %v673_v7  ;;  %1508 = vst [vmem:[%s2442_s28 + $0x69] sm:$0x3f] %v1444_v45  ;;  %v672_v50 = vadd.f32 %v608_v35, %v2417_v47  ;;  %v610_v42 = vmul.f32 %v2398_v44, %v3178_v40  ;;  %v675_v9 = vadd.f32 %v611_v3, %v2417_v47 }
 0x1c2   : > { %1511 = vst [vmem:[%s2442_s28 + $0x81] sm:$0x3f] %v1447_v14  ;;  %v1385_v56 = vmul.f32 %v2422_v48, %v1181_v0  ;;  %v613_v4 = vmul.f32 %v2398_v44, %v3179_v62  ;;  %v1446_v1 = vadd.f32 %v1382_v52, %v1058_v6  ;;  %v998_v55 = vmul.f32 %v2400_v53, %v2267_v11  ;;  %v1177_v60 = vpop.permute.xlu1 %1176 }
 0x1c3   : > { %v1060_v5 = vadd.f32 %v996_v57, %v672_v50  ;;  %v1063_v12 = vadd.f32 %v999_v37, %v675_v9  ;;  %v1001_v8 = vmul.f32 %v2400_v53, %v2277_v18  ;;  %v1384_v61 = vmul.f32 %v2422_v48, %v1177_v60  ;;  %v3185_v60 = vld [vmem:[#allocation42_spill] sm:$0xff] }
 0x1c4   : > { %v1449_v16 = vadd.f32 %v1385_v56, %v1061_v49  ;;  %1510 = vst [vmem:[%s2442_s28 + $0x79] sm:$0x3f] %v1446_v1  ;;  %v674_v63 = vadd.f32 %v610_v42, %v2417_v47  ;;  %v612_v59 = vmul.f32 %v2398_v44, %v3180_v46  ;;  %v677_v11 = vadd.f32 %v613_v4, %v2417_v47  ;;  %v3183_v49 = vld [vmem:[#allocation40_spill] sm:$0xff] }
 0x1c5   : > { %v1189_v51 = vpop.permute.xlu0 %1188  ;;  %v615_v58 = vmul.f32 %v2398_v44, %v3181_v41  ;;  %v1448_v54 = vadd.f32 %v1384_v61, %v1060_v5  ;;  %v1000_v35 = vmul.f32 %v2400_v53, %v2273_v13  ;;  %v1003_v45 = vmul.f32 %v2400_v53, %v2283_v20  ;;  %v3184_v5 = vld [vmem:[#allocation37_spill] sm:$0xff] }
 0x1c6   : > { %1513 = vst [vmem:[%s2442_s28 + $0x91] sm:$0x3f] %v1449_v16  ;;  %v1387_v39 = vmul.f32 %v2422_v48, %v1189_v51  ;;  %v1062_v2 = vadd.f32 %v998_v55, %v674_v63  ;;  %v1185_v7 = vpop.permute.xlu1 %1184  ;;  %v1065_v3 = vadd.f32 %v1001_v8, %v677_v11  ;;  %v676_v57 = vadd.f32 %v612_v59, %v2417_v47 }
 0x1c7   : > { %1512 = vst [vmem:[%s2442_s28 + $0x89] sm:$0x3f] %v1448_v54  ;;  %v1386_v14 = vmul.f32 %v2422_v48, %v1185_v7  ;;  %v614_v0 = vmul.f32 %v2398_v44, %v3182_v10  ;;  %v679_v13 = vadd.f32 %v615_v58, %v2417_v47  ;;  %v617_v37 = vmul.f32 %v2398_v44, %v3183_v49  ;;  %v3186_v54 = vld [vmem:[#allocation39_spill] sm:$0xff]  ;;  %v3188_v49 = vld [vmem:[#allocation41_spill] sm:$0xff] }
 0x1c8   : > { %v1451_v18 = vadd.f32 %v1387_v39, %v1063_v12  ;;  %v1064_v56 = vadd.f32 %v1000_v35, %v676_v57  ;;  %v1002_v50 = vmul.f32 %v2400_v53, %v2279_v15  ;;  %v1005_v62 = vmul.f32 %v2400_v53, %v2289_v22 }
 0x1c9   : > { %v1197_v43 = vpop.permute.xlu0 %1196  ;;  %v1450_v52 = vadd.f32 %v1386_v14, %v1062_v2  ;;  %v1067_v9 = vadd.f32 %v1003_v45, %v679_v13  ;;  %v678_v16 = vadd.f32 %v614_v0, %v2417_v47  ;;  %v616_v55 = vmul.f32 %v2398_v44, %v3184_v5  ;;  %v3187_v2 = vld [vmem:[#allocation44_spill] sm:$0xff] }
 0x1ca   : > { %1515 = vst [vmem:[%s2442_s28 + $0xa1] sm:$0x3f] %v1451_v18  ;;  %v1389_v6 = vmul.f32 %v2422_v48, %v1197_v43  ;;  %v1193_v40 = vpop.permute.xlu1 %1192  ;;  %v681_v15 = vadd.f32 %v617_v37, %v2417_v47  ;;  %v619_v51 = vmul.f32 %v2398_v44, %v3185_v60  ;;  %v1004_v61 = vmul.f32 %v2400_v53, %v2285_v17  ;;  %v3191_v60 = vld [vmem:[#allocation48_spill] sm:$0xff] }
 0x1cb   : > { %1514 = vst [vmem:[%s2442_s28 + $0x99] sm:$0x3f] %v1450_v52  ;;  %v1388_v4 = vmul.f32 %v2422_v48, %v1193_v40  ;;  %v1066_v8 = vadd.f32 %v1002_v50, %v678_v16  ;;  %v1007_v59 = vmul.f32 %v2400_v53, %v2295_v24  ;;  %v680_v58 = vadd.f32 %v616_v55, %v2417_v47  ;;  %v3189_v52 = vld [vmem:[#allocation46_spill] sm:$0xff]  ;;  %v3190_v55 = vld [vmem:[#allocation43_spill] sm:$0xff] }
 0x1cc   : > { %v1453_v20 = vadd.f32 %v1389_v6, %v1065_v3  ;;  %v1069_v46 = vadd.f32 %v1005_v62, %v681_v15  ;;  %v618_v18 = vmul.f32 %v2398_v44, %v3186_v54  ;;  %v683_v17 = vadd.f32 %v619_v51, %v2417_v47 }
 0x1cd   : > { %v1205_v42 = vpop.permute.xlu0 %1204  ;;  %v1452_v12 = vadd.f32 %v1388_v4, %v1064_v56  ;;  %v621_v35 = vmul.f32 %v2398_v44, %v3187_v2  ;;  %v1068_v43 = vadd.f32 %v1004_v61, %v680_v58  ;;  %v1006_v3 = vmul.f32 %v2400_v53, %v2291_v19  ;;  %v3192_v58 = vld [vmem:[#allocation45_spill] sm:$0xff] }
 0x1ce   : > { %1517 = vst [vmem:[%s2442_s28 + $0xb1] sm:$0x3f] %v1453_v20  ;;  %v1391_v1 = vmul.f32 %v2422_v48, %v1205_v42  ;;  %v1201_v39 = vpop.permute.xlu1 %1200  ;;  %v1071_v6 = vadd.f32 %v1007_v59, %v683_v17  ;;  %v1009_v57 = vmul.f32 %v2400_v53, %v2301_v26  ;;  %v682_v13 = vadd.f32 %v618_v18, %v2417_v47  ;;  %v3193_v18 = vld [vmem:[#allocation50_spill] sm:$0xff] }
 0x1cf   : > { %1516 = vst [vmem:[%s2442_s28 + $0xa9] sm:$0x3f] %v1452_v12  ;;  %v1390_v11 = vmul.f32 %v2422_v48, %v1201_v39  ;;  %v620_v37 = vmul.f32 %v2398_v44, %v3188_v49  ;;  %v685_v19 = vadd.f32 %v621_v35, %v2417_v47  ;;  %v623_v20 = vmul.f32 %v2398_v44, %v3189_v52 }
 0x1d0   : > { %v1455_v22 = vadd.f32 %v1391_v1, %v1067_v9  ;;  %v1070_v50 = vadd.f32 %v1006_v3, %v682_v13  ;;  %v1008_v40 = vmul.f32 %v2400_v53, %v2297_v21  ;;  %v1011_v4 = vmul.f32 %v2400_v53, %v2307_v28  ;;  %v3195_v13 = vld [vmem:[#allocation52_spill] sm:$0xff] }
 0x1d1   : > { %v1213_v63 = vpop.permute.xlu0 %1212  ;;  %v1454_v7 = vadd.f32 %v1390_v11, %v1066_v8  ;;  %v1073_v62 = vadd.f32 %v1009_v57, %v685_v19  ;;  %v684_v5 = vadd.f32 %v620_v37, %v2417_v47  ;;  %v622_v15 = vmul.f32 %v2398_v44, %v3190_v55 }
 0x1d2   : > { %1519 = vst [vmem:[%s2442_s28 + $0xc1] sm:$0x3f] %v1455_v22  ;;  %v1393_v41 = vmul.f32 %v2422_v48, %v1213_v63  ;;  %v1209_v45 = vpop.permute.xlu1 %1208  ;;  %v687_v21 = vadd.f32 %v623_v20, %v2417_v47  ;;  %v625_v51 = vmul.f32 %v2398_v44, %v3191_v60  ;;  %v1010_v8 = vmul.f32 %v2400_v53, %v2303_v23 }
 0x1d3   : > { %1518 = vst [vmem:[%s2442_s28 + $0xb9] sm:$0x3f] %v1454_v7  ;;  %v1392_v10 = vmul.f32 %v2422_v48, %v1209_v45  ;;  %v1072_v22 = vadd.f32 %v1008_v40, %v684_v5  ;;  %v624_v54 = vmul.f32 %v2398_v44, %v3192_v58  ;;  %v627_v17 = vmul.f32 %v2398_v44, %v3193_v18 }
 0x1d4   : > { %v1457_v24 = vadd.f32 %v1393_v41, %v1069_v46  ;;  %v1075_v63 = vadd.f32 %v1011_v4, %v687_v21  ;;  %v1013_v46 = vmul.f32 %v2400_v53, %v2313_v30  ;;  %v686_v41 = vadd.f32 %v622_v15, %v2417_v47 }
 0x1d5   : > { %v1221_v14 = vpop.permute.xlu0 %1220  ;;  %v1456_v56 = vadd.f32 %v1392_v10, %v1068_v43  ;;  %v689_v23 = vadd.f32 %v625_v51, %v2417_v47  ;;  %v1012_v7 = vmul.f32 %v2400_v53, %v2309_v25  ;;  %v1015_v45 = vmul.f32 %v2400_v53, %v2319_v32  ;;  %v3194_v10 = vld [vmem:[#allocation47_spill] sm:$0xff] }
 0x1d6   : > { %1521 = vst [vmem:[%s2442_s28 + $0xd1] sm:$0x3f] %v1457_v24  ;;  %v1395_v0 = vmul.f32 %v2422_v48, %v1221_v14  ;;  %v1217_v42 = vpop.permute.xlu1 %1216  ;;  %v1074_v35 = vadd.f32 %v1010_v8, %v686_v41  ;;  %v688_v57 = vadd.f32 %v624_v54, %v2417_v47  ;;  %v691_v25 = vadd.f32 %v627_v17, %v2417_v47 }
 0x1d7   : > { %1520 = vst [vmem:[%s2442_s28 + $0xc9] sm:$0x3f] %v1456_v56  ;;  %v1394_v1 = vmul.f32 %v2422_v48, %v1217_v42  ;;  %v1077_v3 = vadd.f32 %v1013_v46, %v689_v23  ;;  %v629_v49 = vmul.f32 %v2398_v44, %v3195_v13  ;;  %v1014_v52 = vmul.f32 %v2400_v53, %v2315_v27 }
 0x1d8   : > { %v1459_v26 = vadd.f32 %v1395_v0, %v1071_v6  ;;  %v626_v0 = vmul.f32 %v2398_v44, %v3194_v10  ;;  %v1076_v19 = vadd.f32 %v1012_v7, %v688_v57  ;;  %v1016_v15 = vmul.f32 %v2400_v53, %v2321_v29 }
 0x1d9   : > { %v1229_v9 = vpop.permute.xlu0 %1228  ;;  %v1458_v12 = vadd.f32 %v1394_v1, %v1070_v50  ;;  %v1017_v50 = vmul.f32 %v2400_v53, %v2325_v34  ;;  %v693_v27 = vadd.f32 %v629_v49, %v2417_v47  ;;  %v3197_v1 = vld [vmem:[#allocation54_spill] sm:$0xff]  ;;  %v1018_v41 = vmul.f32 %v2400_v53, %v2327_v31 }
 0x1da   : > { %1523 = vst [vmem:[%s2442_s28 + $0xe1] sm:$0x3f] %v1459_v26  ;;  %v1397_v16 = vmul.f32 %v2422_v48, %v1229_v9  ;;  %v1225_v61 = vpop.permute.xlu1 %1224  ;;  %v1079_v26 = vadd.f32 %v1015_v45, %v691_v25  ;;  %v690_v9 = vadd.f32 %v626_v0, %v2417_v47  ;;  %v1021_v18 = vmul.f32 %v2400_v53, %v2337_v38  ;;  %v3202_v0 = vld [vmem:[#allocation74_spill] sm:$0xff] }
 0x1db   : > { %1522 = vst [vmem:[%s2442_s28 + $0xd9] sm:$0x3f] %v1458_v12  ;;  %v1396_v59 = vmul.f32 %v2422_v48, %v1225_v61  ;;  %v1081_v51 = vadd.f32 %v1017_v50, %v693_v27  ;;  %v1019_v12 = vmul.f32 %v2400_v53, %v2331_v36  ;;  %v3198_v61 = vld [vmem:[#allocation51_spill] sm:$0xff]  ;;  %v1023_v25 = vmul.f32 %v2400_v53, %v3202_v0  ;;  %v3206_v27 = vld [vmem:[#allocation76_spill] sm:$0xff] }
 0x1dc   : > { %v1461_v28 = vadd.f32 %v1397_v16, %v1073_v62  ;;  %v3196_v62 = vld [vmem:[#allocation49_spill] sm:$0xff]  ;;  %v631_v16 = vmul.f32 %v2398_v44, %v3197_v1  ;;  %v1078_v55 = vadd.f32 %v1014_v52, %v690_v9  ;;  %v3204_v52 = vld [vmem:[#allocation60_spill] sm:$0xff]  ;;  %v1025_v1 = vmul.f32 %v2400_v53, %v3206_v27 }
 0x1dd   : > { %v1237_v39 = vpop.permute.xlu0 %1236  ;;  %v1460_v2 = vadd.f32 %v1396_v59, %v1072_v22  ;;  %v628_v4 = vmul.f32 %v2398_v44, %v3196_v62 }
 0x1de   : > { %1525 = vst [vmem:[%s2442_s28 + $0xf1] sm:$0x3f] %v1461_v28  ;;  %v1399_v11 = vmul.f32 %v2422_v48, %v1237_v39  ;;  %v1233_v24 = vpop.permute.xlu1 %1232  ;;  %v630_v39 = vmul.f32 %v2398_v44, %v3198_v61  ;;  %v695_v29 = vadd.f32 %v631_v16, %v2417_v47 }
 0x1df   : > { %1524 = vst [vmem:[%s2442_s28 + $0xe9] sm:$0x3f] %v1460_v2  ;;  %v1398_v14 = vmul.f32 %v2422_v48, %v1233_v24  ;;  %v692_v8 = vadd.f32 %v628_v4, %v2417_v47  ;;  %v3201_v24 = vld [vmem:[#allocation58_spill] sm:$0xff] }
 0x1e0   : > { %v1463_v30 = vadd.f32 %v1399_v11, %v1075_v63  ;;  %v3199_v63 = vld [vmem:[#allocation56_spill] sm:$0xff]  ;;  %v1083_v23 = vadd.f32 %v1019_v12, %v695_v29 }
 0x1e1   : > { %v1245_v43 = vpop.permute.xlu0 %1244  ;;  %v1462_v37 = vadd.f32 %v1398_v14, %v1074_v35  ;;  %v633_v46 = vmul.f32 %v2398_v44, %v3199_v63  ;;  %v1080_v11 = vadd.f32 %v1016_v15, %v692_v8  ;;  %v3200_v35 = vld [vmem:[#allocation53_spill] sm:$0xff]  ;;  %v1020_v14 = vmul.f32 %v2400_v53, %v2333_v33  ;;  %v3209_v8 = vld [vmem:[#allocation75_spill] sm:$0xff] }
 0x1e2   : > { %1527 = vst [vmem:[%s2442_s28 + $0x101] sm:$0x3f] %v1463_v30  ;;  %v1401_v6 = vmul.f32 %v2422_v48, %v1245_v43  ;;  %v1241_v20 = vpop.permute.xlu1 %1240  ;;  %v694_v30 = vadd.f32 %v630_v39, %v2417_v47  ;;  %v632_v7 = vmul.f32 %v2398_v44, %v3200_v35  ;;  %v635_v43 = vmul.f32 %v2398_v44, %v3201_v24 }
 0x1e3   : > { %1526 = vst [vmem:[%s2442_s28 + $0xf9] sm:$0x3f] %v1462_v37  ;;  %v1400_v40 = vmul.f32 %v2422_v48, %v1241_v20  ;;  %v697_v31 = vadd.f32 %v633_v46, %v2417_v47  ;;  %v637_v20 = vmul.f32 %v2398_v44, %v3204_v52  ;;  %v1024_v61 = vmul.f32 %v2400_v53, %v3209_v8  ;;  %v3210_v46 = vld [vmem:[#allocation78_spill] sm:$0xff] }
 0x1e4   : > { %v1465_v32 = vadd.f32 %v1401_v6, %v1077_v3  ;;  %v1082_v45 = vadd.f32 %v1018_v41, %v694_v30  ;;  %v696_v37 = vadd.f32 %v632_v7, %v2417_v47  ;;  %v699_v33 = vadd.f32 %v635_v43, %v2417_v47  ;;  %v3213_v7 = vld [vmem:[#allocation77_spill] sm:$0xff] }
 0x1e5   : > { %v1253_v56 = vpop.permute.xlu0 %1252  ;;  %v1464_v5 = vadd.f32 %v1400_v40, %v1076_v19  ;;  %v1085_v10 = vadd.f32 %v1021_v18, %v697_v31  ;;  %v3205_v40 = vld [vmem:[#allocation12_spill] sm:$0xff]  ;;  %v1026_v31 = vmul.f32 %v2400_v53, %v3213_v7 }
 0x1e6   : > { %1529 = vst [vmem:[%s2442_s28 + $0x111] sm:$0x3f] %v1465_v32  ;;  %v1403_v42 = vmul.f32 %v2422_v48, %v1253_v56  ;;  %v1249_v21 = vpop.permute.xlu1 %1248  ;;  %v3203_v32 = vld [vmem:[#allocation55_spill] sm:$0xff]  ;;  %v1084_v50 = vadd.f32 %v1020_v14, %v696_v37  ;;  %v1087_v4 = vadd.f32 %v1023_v25, %v699_v33  ;;  %v3212_v18 = vld [vmem:[#allocation64_spill] sm:$0xff] }
 0x1e7   : > { %1528 = vst [vmem:[%s2442_s28 + $0x109] sm:$0x3f] %v1464_v5  ;;  %v1402_v28 = vmul.f32 %v2422_v48, %v1249_v21  ;;  %v634_v19 = vmul.f32 %v2398_v44, %v3203_v32  ;;  %v701_v21 = vadd.f32 %v637_v20, %v2417_v47  ;;  %v3217_v33 = vld [vmem:[#allocation79_spill] sm:$0xff] }
 0x1e8   : > { %v1467_v34 = vadd.f32 %v1403_v42, %v1079_v26  ;;  %v1022_v42 = vmul.f32 %v2400_v53, %v3205_v40  ;;  %v1028_v52 = vmul.f32 %v2400_v53, %v3217_v33 }
 0x1e9   : > { %v1261_v60 = vpop.permute.xlu0 %1260  ;;  %v1466_v59 = vadd.f32 %v1402_v28, %v1078_v55  ;;  %v3207_v55 = vld [vmem:[#allocation57_spill] sm:$0xff]  ;;  %v1089_v63 = vadd.f32 %v1025_v1, %v701_v21 }
 0x1ea   : > { %1531 = vst [vmem:[%s2442_s28 + $0x121] sm:$0x3f] %v1467_v34  ;;  %v1405_v22 = vmul.f32 %v2422_v48, %v1261_v60  ;;  %v1257_v58 = vpop.permute.xlu1 %1256  ;;  %v698_v34 = vadd.f32 %v634_v19, %v2417_v47  ;;  %v636_v15 = vmul.f32 %v2398_v44, %v3207_v55  ;;  %v3208_v60 = vld [vmem:[#allocation62_spill] sm:$0xff]  ;;  %v3221_v21 = vld [vmem:[#allocation81_spill] sm:$0xff] }
 0x1eb   : > { %1530 = vst [vmem:[%s2442_s28 + $0x119] sm:$0x3f] %v1466_v59  ;;  %v1404_v17 = vmul.f32 %v2422_v48, %v1257_v58  ;;  %v1027_v59 = vmul.f32 %v2400_v53, %v3210_v46  ;;  %v3211_v58 = vld [vmem:[#allocation59_spill] sm:$0xff] }
 0x1ec   : > { %v1469_v36 = vadd.f32 %v1405_v22, %v1081_v51  ;;  %v639_v51 = vmul.f32 %v2398_v44, %v3208_v60  ;;  %v1086_v22 = vadd.f32 %v1022_v42, %v698_v34  ;;  %v700_v41 = vadd.f32 %v636_v15, %v2417_v47 }
 0x1ed   : > { %v1269_v54 = vpop.permute.xlu0 %1268  ;;  %v1468_v3 = vadd.f32 %v1404_v17, %v1080_v11  ;;  %v641_v17 = vmul.f32 %v2398_v44, %v3212_v18  ;;  %v1030_v60 = vmul.f32 %v2400_v53, %v3221_v21 }
 0x1ee   : > { %1533 = vst [vmem:[%s2442_s28 + $0x131] sm:$0x3f] %v1469_v36  ;;  %v1407_v2 = vmul.f32 %v2422_v48, %v1269_v54  ;;  %v1265_v6 = vpop.permute.xlu1 %1264  ;;  %v638_v54 = vmul.f32 %v2398_v44, %v3211_v58  ;;  %v1088_v35 = vadd.f32 %v1024_v61, %v700_v41 }
 0x1ef   : > { %1532 = vst [vmem:[%s2442_s28 + $0x129] sm:$0x3f] %v1468_v3  ;;  %v1406_v13 = vmul.f32 %v2422_v48, %v1265_v6  ;;  %v705_v25 = vadd.f32 %v641_v17, %v2417_v47 }
 0x1f0   : > { %v1471_v38 = vadd.f32 %v1407_v2, %v1083_v23  ;;  %v703_v23 = vadd.f32 %v639_v51, %v2417_v47 }
 0x1f1   : > { %v1277_v57 = vpop.permute.xlu0 %1276  ;;  %v1470_v56 = vadd.f32 %v1406_v13, %v1082_v45  ;;  %v3216_v13 = vld [vmem:[#allocation66_spill] sm:$0xff] }
 0x1f2   : > { %1535 = vst [vmem:[%s2442_s28 + $0x141] sm:$0x3f] %v1471_v38  ;;  %v1409_v49 = vmul.f32 %v2422_v48, %v1277_v57  ;;  %v1273_v9 = vpop.permute.xlu1 %1272  ;;  %v1091_v3 = vadd.f32 %v1027_v59, %v703_v23  ;;  %v3214_v38 = vld [vmem:[#allocation80_spill] sm:$0xff]  ;;  %v702_v57 = vadd.f32 %v638_v54, %v2417_v47  ;;  %v3225_v23 = vld [vmem:[#allocation83_spill] sm:$0xff] }
 0x1f3   : > { %1534 = vst [vmem:[%s2442_s28 + $0x139] sm:$0x3f] %v1470_v56  ;;  %v1408_v16 = vmul.f32 %v2422_v48, %v1273_v9  ;;  %v1029_v45 = vmul.f32 %v2400_v53, %v3214_v38  ;;  %v1032_v18 = vmul.f32 %v2400_v53, %v3225_v23 }
 0x1f4   : > { %v1473_v26 = vadd.f32 %v1409_v49, %v1085_v10  ;;  %v3215_v10 = vld [vmem:[#allocation61_spill] sm:$0xff]  ;;  %v643_v49 = vmul.f32 %v2398_v44, %v3216_v13  ;;  %v1090_v19 = vadd.f32 %v1026_v31, %v702_v57 }
 0x1f5   : > { %v1285_v62 = vpop.permute.xlu0 %1284  ;;  %v1472_v12 = vadd.f32 %v1408_v16, %v1084_v50  ;;  %v640_v0 = vmul.f32 %v2398_v44, %v3215_v10  ;;  %v3218_v50 = vld [vmem:[#allocation82_spill] sm:$0xff]  ;;  %v3220_v16 = vld [vmem:[#allocation68_spill] sm:$0xff] }
 0x1f6   : > { %1537 = vst [vmem:[%s2442_s28 + $0x151] sm:$0x3f] %v1473_v26  ;;  %v1411_v5 = vmul.f32 %v2422_v48, %v1285_v62  ;;  %v1281_v39 = vpop.permute.xlu1 %1280  ;;  %v1093_v26 = vadd.f32 %v1029_v45, %v705_v25  ;;  %v1031_v40 = vmul.f32 %v2400_v53, %v3218_v50  ;;  %v707_v1 = vadd.f32 %v643_v49, %v2417_v47  ;;  %v3229_v25 = vld [vmem:[#allocation5_spill] sm:$0xff] }
 0x1f7   : > { %1536 = vst [vmem:[%s2442_s28 + $0x149] sm:$0x3f] %v1472_v12  ;;  %v1410_v36 = vmul.f32 %v2422_v48, %v1281_v39  ;;  %v704_v62 = vadd.f32 %v640_v0, %v2417_v47  ;;  %v1034_v13 = vmul.f32 %v2400_v53, %v3229_v25  ;;  %v3241_v25 = vld [vmem:[#allocation11_spill] sm:$0xff] }
 0x1f8   : > { %v1475_v28 = vadd.f32 %v1411_v5, %v1087_v4  ;;  %v3219_v4 = vld [vmem:[#allocation63_spill] sm:$0xff]  ;;  %v645_v5 = vmul.f32 %v2398_v44, %v3220_v16 }
 0x1f9   : > { %v1293_v29 = vpop.permute.xlu0 %1292  ;;  %v1474_v2 = vadd.f32 %v1410_v36, %v1086_v22  ;;  %v642_v27 = vmul.f32 %v2398_v44, %v3219_v4  ;;  %v1092_v15 = vadd.f32 %v1028_v52, %v704_v62  ;;  %v3222_v22 = vld [vmem:[#allocation2_spill] sm:$0xff] }
 0x1fa   : > { %1539 = vst [vmem:[%s2442_s28 + $0x161] sm:$0x3f] %v1475_v28  ;;  %v1413_v11 = vmul.f32 %v2422_v48, %v1293_v29  ;;  %v1289_v24 = vpop.permute.xlu1 %1288  ;;  %v1095_v28 = vadd.f32 %v1031_v40, %v707_v1  ;;  %v1033_v8 = vmul.f32 %v2400_v53, %v3222_v22  ;;  %v709_v59 = vadd.f32 %v645_v5, %v2417_v47  ;;  %v3224_v36 = vld [vmem:[#allocation70_spill] sm:$0xff]  ;;  %v3233_v1 = vld [vmem:[#allocation7_spill] sm:$0xff] }
 0x1fb   : > { %1538 = vst [vmem:[%s2442_s28 + $0x159] sm:$0x3f] %v1474_v2  ;;  %v1412_v14 = vmul.f32 %v2422_v48, %v1289_v24  ;;  %v706_v29 = vadd.f32 %v642_v27, %v2417_v47  ;;  %v1036_v16 = vmul.f32 %v2400_v53, %v3233_v1 }
 0x1fc   : > { %v1477_v30 = vadd.f32 %v1413_v11, %v1089_v63  ;;  %v3223_v63 = vld [vmem:[#allocation65_spill] sm:$0xff]  ;;  %v647_v11 = vmul.f32 %v2398_v44, %v3224_v36 }
 0x1fd   : > { %v1301_v43 = vpop.permute.xlu0 %1300  ;;  %v1476_v37 = vadd.f32 %v1412_v14, %v1088_v35  ;;  %v644_v46 = vmul.f32 %v2398_v44, %v3223_v63  ;;  %v1094_v54 = vadd.f32 %v1030_v60, %v706_v29  ;;  %v3226_v35 = vld [vmem:[#allocation3_spill] sm:$0xff]  ;;  %v3228_v14 = vld [vmem:[#allocation72_spill] sm:$0xff] }
 0x1fe   : > { %1541 = vst [vmem:[%s2442_s28 + $0x171] sm:$0x3f] %v1477_v30  ;;  %v1415_v6 = vmul.f32 %v2422_v48, %v1301_v43  ;;  %v1297_v20 = vpop.permute.xlu1 %1296  ;;  %v1097_v30 = vadd.f32 %v1033_v8, %v709_v59  ;;  %v1035_v7 = vmul.f32 %v2400_v53, %v3226_v35  ;;  %v711_v45 = vadd.f32 %v647_v11, %v2417_v47  ;;  %v3237_v59 = vld [vmem:[#allocation84_spill] sm:$0xff] }
 0x1ff   : > { %1540 = vst [vmem:[%s2442_s28 + $0x169] sm:$0x3f] %v1476_v37  ;;  %v1414_v42 = vmul.f32 %v2422_v48, %v1297_v20  ;;  %v708_v43 = vadd.f32 %v644_v46, %v2417_v47  ;;  %v1708_v20 = vld [vmem:[%s3030_s3] sm:$0x3f]  ;;  %v1038_v36 = vmul.f32 %v2400_v53, %v3237_v59 }
 0x200   : > { %v1479_v32 = vadd.f32 %v1415_v6, %v1091_v3  ;;  %v3227_v3 = vld [vmem:[#allocation67_spill] sm:$0xff]  ;;  %v649_v6 = vmul.f32 %v2398_v44, %v3228_v14 }
 0x201   : > { %v1309_v56 = vpop.permute.xlu0 %1308  ;;  %v1478_v34 = vadd.f32 %v1414_v42, %v1090_v19  ;;  %v646_v38 = vmul.f32 %v2398_v44, %v3227_v3  ;;  %v1096_v0 = vadd.f32 %v1032_v18, %v708_v43  ;;  %v3230_v19 = vld [vmem:[#allocation4_spill] sm:$0xff]  ;;  %v3232_v42 = vld [vmem:[#allocation73_spill] sm:$0xff] }
 0x202   : > { %1543 = vst [vmem:[%s2442_s28 + $0x181] sm:$0x3f] %v1479_v32  ;;  %v1417_v9 = vmul.f32 %v2422_v48, %v1309_v56  ;;  %v1305_v51 = vpop.permute.xlu1 %1304  ;;  %v1099_v32 = vadd.f32 %v1035_v7, %v711_v45  ;;  %v1037_v33 = vmul.f32 %v2400_v53, %v3230_v19  ;;  %v713_v40 = vadd.f32 %v1708_v20, %v649_v6  ;;  %v3240_v45 = vld [vmem:[#allocation85_spill] sm:$0xff] }
 0x203   : > { %1542 = vst [vmem:[%s2442_s28 + $0x179] sm:$0x3f] %v1478_v34  ;;  %v1416_v61 = vmul.f32 %v2422_v48, %v1305_v51  ;;  %v710_v56 = vadd.f32 %v1708_v20, %v646_v38  ;;  %v1040_v14 = vmul.f32 %v2400_v53, %v3240_v45 }
 0x204   : > { %v1481_v55 = vadd.f32 %v1417_v9, %v1093_v26  ;;  %v3231_v26 = vld [vmem:[#allocation69_spill] sm:$0xff]  ;;  %v651_v9 = vmul.f32 %v2398_v44, %v3232_v42 }
 0x205   : > { %v1317_v12 = vpop.permute.xlu0 %1316  ;;  %v1480_v41 = vadd.f32 %v1416_v61, %v1092_v15  ;;  %v648_v50 = vmul.f32 %v2398_v44, %v3231_v26  ;;  %v1098_v27 = vadd.f32 %v1034_v13, %v710_v56  ;;  %v3234_v15 = vld [vmem:[#allocation6_spill] sm:$0xff]  ;;  %v654_v13 = vmul.f32 %v2398_v44, %v3241_v25 }
 0x206   : > { %1545 = vst [vmem:[%s2442_s28 + $0x191] sm:$0x3f] %v1481_v55  ;;  %v1419_v39 = vmul.f32 %v2422_v48, %v1317_v12  ;;  %v1313_v17 = vpop.permute.xlu1 %1312  ;;  %v1101_v55 = vadd.f32 %v1037_v33, %v713_v40  ;;  %v1039_v21 = vmul.f32 %v2400_v53, %v3234_v15  ;;  %v715_v8 = vadd.f32 %v1708_v20, %v651_v9  ;;  %v3236_v61 = vld [vmem:[#allocation10_spill] sm:$0xff]  ;;  %v3242_v33 = vld [vmem:[#allocation16_spill] sm:$0xff] }
 0x207   : > { %1544 = vst [vmem:[%s2442_s28 + $0x189] sm:$0x3f] %v1480_v41  ;;  %v1418_v31 = vmul.f32 %v2422_v48, %v1313_v17  ;;  %v712_v12 = vadd.f32 %v1708_v20, %v648_v50  ;;  %v718_v56 = vadd.f32 %v1708_v20, %v654_v13 }
 0x208   : > { %v1483_v58 = vadd.f32 %v1419_v39, %v1095_v28  ;;  %v3235_v28 = vld [vmem:[#allocation71_spill] sm:$0xff]  ;;  %v653_v39 = vmul.f32 %v2398_v44, %v3236_v61 }
 0x209   : > { %v1325_v2 = vpop.permute.xlu0 %1324  ;;  %v1482_v57 = vadd.f32 %v1418_v31, %v1094_v54  ;;  %v650_v22 = vmul.f32 %v2398_v44, %v3235_v28  ;;  %v1100_v46 = vadd.f32 %v1036_v16, %v712_v12  ;;  %v3238_v54 = vld [vmem:[#allocation8_spill] sm:$0xff] }
 0x20a   : > { %1547 = vst [vmem:[%s2442_s28 + $0x1a1] sm:$0x3f] %v1483_v58  ;;  %v1421_v24 = vmul.f32 %v2422_v48, %v1325_v2  ;;  %v1321_v49 = vpop.permute.xlu1 %1320  ;;  %v1103_v58 = vadd.f32 %v1039_v21, %v715_v8  ;;  %v1041_v23 = vmul.f32 %v2400_v53, %v3238_v54  ;;  %v717_v7 = vadd.f32 %v1708_v20, %v653_v39 }
 0x20b   : > { %1546 = vst [vmem:[%s2442_s28 + $0x199] sm:$0x3f] %v1482_v57  ;;  %v1420_v47 = vmul.f32 %v2422_v48, %v1321_v49  ;;  %v714_v2 = vadd.f32 %v1708_v20, %v650_v22 }
 0x20c   : > { %v1485_v10 = vadd.f32 %v1421_v24, %v1097_v30  ;;  %v3239_v30 = vld [vmem:[#allocation9_spill] sm:$0xff]  ;;  %v1105_v6 = vadd.f32 %v1041_v23, %v717_v7 }
 0x20d   : > { %v1333_v37 = vpop.permute.xlu0 %1332  ;;  %v1484_v62 = vadd.f32 %v1420_v47, %v1096_v0  ;;  %v652_v35 = vmul.f32 %v2398_v44, %v3239_v30  ;;  %v1102_v43 = vadd.f32 %v1038_v36, %v714_v2  ;;  %v1042_v47 = vmul.f32 %v2400_v53, %v3242_v33 }
 0x20e   : > { %1549 = vst [vmem:[%s2442_s28 + $0x1b1] sm:$0x3f] %v1485_v10  ;;  %v1423_v52 = vmul.f32 %v2422_v48, %v1333_v37  ;;  %v1329_v5 = vpop.permute.xlu1 %1328 }
 0x20f   : > { %1548 = vst [vmem:[%s2442_s28 + $0x1a9] sm:$0x3f] %v1484_v62  ;;  %v1422_v60 = vmul.f32 %v2422_v48, %v1329_v5  ;;  %v716_v0 = vadd.f32 %v1708_v20, %v652_v35  ;;  %v1106_v40 = vadd.f32 %v1042_v47, %v718_v56 }
 0x210   : > { %v1487_v4 = vadd.f32 %v1423_v52, %v1099_v32 }
 0x211   : > { %v1341_v34 = vpop.permute.xlu0 %1340  ;;  %v1486_v29 = vadd.f32 %v1422_v60, %v1098_v27  ;;  %v1104_v19 = vadd.f32 %v1040_v14, %v716_v0 }
 0x212   : > { %1551 = vst [vmem:[%s2442_s28 + $0x1c1] sm:$0x3f] %v1487_v4  ;;  %v1425_v51 = vmul.f32 %v2422_v48, %v1341_v34  ;;  %v1337_v11 = vpop.permute.xlu1 %1336 }
 0x213   : > { %1550 = vst [vmem:[%s2442_s28 + $0x1b9] sm:$0x3f] %v1486_v29  ;;  %v1424_v18 = vmul.f32 %v2422_v48, %v1337_v11 }
 0x214   : > { %v1489_v63 = vadd.f32 %v1425_v51, %v1101_v55 }
 0x215   : > { %v1349_v41 = vpop.permute.xlu0 %1348  ;;  %v1488_v31 = vadd.f32 %v1424_v18, %v1100_v46 }
 0x216   : > { %1553 = vst [vmem:[%s2442_s28 + $0x1d1] sm:$0x3f] %v1489_v63  ;;  %v1427_v17 = vmul.f32 %v2422_v48, %v1349_v41  ;;  %v1345_v3 = vpop.permute.xlu1 %1344 }
 0x217   : > { %1552 = vst [vmem:[%s2442_s28 + $0x1c9] sm:$0x3f] %v1488_v31  ;;  %v1426_v57 = vmul.f32 %v2422_v48, %v1345_v3 }
 0x218   : > { %v1491_v24 = vadd.f32 %v1427_v17, %v1103_v58 }
 0x219   : > { %v1357_v38 = vpop.permute.xlu0 %1356  ;;  %v1490_v49 = vadd.f32 %v1426_v57, %v1102_v43 }
 0x21a   : > { %1555 = vst [vmem:[%s2442_s28 + $0x1e1] sm:$0x3f] %v1491_v24  ;;  %v1429_v10 = vmul.f32 %v2422_v48, %v1357_v38  ;;  %v1353_v32 = vpop.permute.xlu1 %1352 }
 0x21b   : > { %1554 = vst [vmem:[%s2442_s28 + $0x1d9] sm:$0x3f] %v1490_v49  ;;  %v1428_v52 = vmul.f32 %v2422_v48, %v1353_v32 }
 0x21c   : > { %v1493_v37 = vadd.f32 %v1429_v10, %v1105_v6 }
 0x21d   : > { %v1492_v26 = vadd.f32 %v1428_v52, %v1104_v19 }
 0x21e   : > { %1557 = vst [vmem:[%s2442_s28 + $0x1f1] sm:$0x3f] %v1493_v37  ;;  %v1361_v50 = vpop.permute.xlu1 %1360 }
 0x21f   : > { %1556 = vst [vmem:[%s2442_s28 + $0x1e9] sm:$0x3f] %v1492_v26  ;;  %v1430_v42 = vmul.f32 %v2422_v48, %v1361_v50 }
 0x221   : > { %v1494_v44 = vadd.f32 %v1430_v42, %v1106_v40 }
 0x223   : > { %1558 = vst [vmem:[%s2442_s28 + $0x1f9] sm:$0x3f] %v1494_v44 }
 0x224 PF: > { %s14_s15 = sadd.s32 1, %s1715_s15  }
 0x225   : > { %p11_p4 = scmp.ge.s32.totalorder %s14_s15, 6  }
 0x227   :  { %13 = sbr.rel (!%p11_p4) target bundleno = 1 (0x1), region = 66 }

</bundles_post_ra>
